<compile_context>
chip_gen: v6e
topology: v6e:2x2x1
jax: 0.10.0
libtpu: 0.0.40
codegen_flags: <defaults>
</compile_context>

<pallas_src>
import functools

import jax
import jax.numpy as jnp
from jax.experimental import pallas as pl
from jax.experimental.pallas import tpu as pltpu


def _round_up(x, m):
    return (x + m - 1) // m * m


def _mgcn_fused_kernel(K, TB, N, dpi, dpo,
                       a_ref, theta_ref, gb_ref, wcat_ref, bcat_ref, x0_hbm,
                       x1_ref,
                       x_carry, h_scr, acc_scr, x0_sem):
    """One (batch-tile, range-k) grid step of the fused MGCN forward.

    a_ref:     (N, N)            bf16  row-normalized adjacency (VMEM resident)
    theta_ref: (K, K*dpi, dpo)   bf16  hop-major stacked GCN weights (resident)
    gb_ref:    (K, 1, dpo)       f32   GCN biases (resident)
    wcat_ref:  (dpo, dpi+dpo)    bf16  [W_lin^T | W_lin^T @ W]   (fused trailing matmuls)
    bcat_ref:  (1, dpi+dpo)      f32   [b_lin   | b_lin @ W + b]
    x0_hbm:    (B*N, dpi)        f32   initial features, left in HBM (pl.ANY)
    x1_ref:    (1, TB*N, dpo)          output block for this (k, batch tile)
    x_carry:   (TB*N, dpi)       f32   X carried across the k axis
    h_scr:     (TB*N, dpi)       bf16  current hop features A^p X
    acc_scr:   (TB*N, dpo)       f32   GCN accumulator
    x0_sem:    DMA semaphore for the one-shot X0 load
    """
    bi = pl.program_id(0)
    k = pl.program_id(1)

    # One-shot load of this batch tile's features; X0 is only needed at k == 0,
    # so it is not kept in the BlockSpec pipeline (saves its VMEM double buffer).
    @pl.when(k == 0)
    def _():
        row0 = pl.multiple_of(bi * (TB * N), TB * N)
        cp = pltpu.make_async_copy(x0_hbm.at[pl.ds(row0, TB * N)], x_carry, x0_sem)
        cp.start()
        cp.wait()

    X = x_carry[...]                                   # (TB*N, dpi) f32
    Xb = X.astype(jnp.bfloat16)

    # ---- GCN_k: acc = sum_{p<=k} A^p X theta[k, p]; propagations gated by k so
    #      only the hops actually required for range k are computed.
    h_scr[...] = Xb
    acc_scr[...] = jnp.dot(Xb, theta_ref[k, pl.ds(0, dpi), :],
                           preferred_element_type=jnp.float32)
    for p in range(1, K):
        @pl.when(p <= k)
        def _(p=p):
            A = a_ref[...]
            # Per-batch propagation A @ H[b], written in place at static offsets
            # (no jnp.concatenate copies).  NOTE: bf16 rounding compounds per hop.
            for b in range(TB):
                sl = pl.ds(b * N, N)
                h_scr[sl, :] = jnp.dot(
                    A, h_scr[sl, :],
                    preferred_element_type=jnp.float32).astype(jnp.bfloat16)
            acc_scr[...] += jnp.dot(h_scr[...],
                                    theta_ref[k, pl.ds(p * dpi, dpi), :],
                                    preferred_element_type=jnp.float32)

    G = jnp.maximum(acc_scr[...] + gb_ref[k], 0.0)     # (TB*N, dpo) f32, ReLU

    # ---- fused Linear(dout->din) + output projection: one 256-wide MXU matmul
    #      [Xn | logits] = G @ [W_lin^T | W_lin^T @ W] + [b_lin | b_lin @ W + b]
    Y = jnp.dot(G.astype(jnp.bfloat16), wcat_ref[...],
                preferred_element_type=jnp.float32) + bcat_ref[...]
    Xn = Y[:, :dpi]                                    # carried to range k+1
    x_carry[...] = Xn
    logits = Y[:, dpi:]
    X1 = pl.reciprocal(1.0 + jnp.exp(-logits), approx=True)   # sigmoid on EUP slot
    x1_ref[0] = X1.astype(x1_ref.dtype)


def _pick_tile_b(B, N, target_rows=128):
    """Largest batch tile with TB*N >= target_rows MXU rows while keeping
    B//TB >= 2 so the 'parallel' axis can still shard over v7x's two cores."""
    tb = max(1, (target_rows + N - 1) // N)
    tb = min(tb, B)
    if B >= 2:
        tb = min(tb, max(1, B // 2))
    while B % tb:
        tb -= 1
    return tb


def mgcn_forward(X, A, params, K, tile_b=None, out_dtype=jnp.float32):
    """Fused MGCN forward.  X: (B, N, din), A: (N, N).  Returns (K, B, N, dout)."""
    B, N, din = X.shape
    dout = params['W'].shape[1]
    TB = _pick_tile_b(B, N) if tile_b is None else tile_b
    assert N % 8 == 0 and B % TB == 0
    dpi = _round_up(din, 128)                          # lane-dense feature dims
    dpo = _round_up(dout, 128)
    f32, bf16 = jnp.float32, jnp.bfloat16

    # ---- lane-dense padding / packing (layout plumbing, done once) ----
    Xp = jnp.zeros((B * N, dpi), f32).at[:, :din].set(X.reshape(B * N, din))
    A_bf = A.astype(bf16)

    theta_packed = jnp.zeros((K, K, dpi, dpo), f32)    # hop-major, zero beyond hop k
    gb_packed = jnp.zeros((K, 1, dpo), f32)
    for k in range(K):
        th = params['gcn_theta'][k]                    # (k+1, din, dout)
        theta_packed = theta_packed.at[k, :k + 1, :din, :dout].set(th)
        gb_packed = gb_packed.at[k, 0, :dout].set(params['gcn_bias'][k])
    theta_packed = theta_packed.reshape(K, K * dpi, dpo).astype(bf16)

    Wlt = jnp.zeros((dpo, dpi), f32).at[:dout, :din].set(params['W_lin'].T)
    bl = jnp.zeros((1, dpi), f32).at[0, :din].set(params['b_lin'])
    Wp = jnp.zeros((dpi, dpo), f32).at[:din, :dout].set(params['W'])
    bp = jnp.zeros((1, dpo), f32).at[0, :dout].set(params['b'])
    # Fuse the two trailing matmuls: Xn = G@Wlt + bl ; logits = Xn@W + b
    #                             => logits = G@(Wlt@W) + (bl@W + b)
    Wcat = jnp.concatenate([Wlt, Wlt @ Wp], axis=1).astype(bf16)    # (dpo, dpi+dpo)
    bcat = jnp.concatenate([bl, bl @ Wp + bp], axis=1)              # (1, dpi+dpo)

    # VMEM budget from the actual buffer sum (x2 for double buffering, +4 MiB
    # slack), clamped to 64 MiB so the same sizing is safe on v7x's VMEM.
    out_bytes = jnp.dtype(out_dtype).itemsize
    est = (N * N * 2 + K * K * dpi * dpo * 2 + K * dpo * 4
           + dpo * (dpi + dpo) * 2 + (dpi + dpo) * 4
           + 2 * TB * N * dpo * out_bytes
           + TB * N * (dpi * 4 + dpi * 2 + dpo * 4))
    vmem_limit = int(min(max(2 * est + (4 << 20), 32 << 20), 64 << 20))

    kernel = functools.partial(_mgcn_fused_kernel, K, TB, N, dpi, dpo)

    out = pl.pallas_call(
        kernel,
        out_shape=jax.ShapeDtypeStruct((K, B * N, dpo), out_dtype),
        grid=(B // TB, K),
        in_specs=[
            pl.BlockSpec((N, N), lambda bi, k: (0, 0)),                  # A (resident)
            pl.BlockSpec((K, K * dpi, dpo), lambda bi, k: (0, 0, 0)),    # theta (resident)
            pl.BlockSpec((K, 1, dpo), lambda bi, k: (0, 0, 0)),          # GCN biases (resident)
            pl.BlockSpec((dpo, dpi + dpo), lambda bi, k: (0, 0)),        # [Wlt | Wlt@W]
            pl.BlockSpec((1, dpi + dpo), lambda bi, k: (0, 0)),          # [bl  | bl@W+b]
            pl.BlockSpec(memory_space=pl.ANY),                           # X0 stays in HBM
        ],
        out_specs=pl.BlockSpec((1, TB * N, dpo), lambda bi, k: (k, bi, 0)),
        scratch_shapes=[
            pltpu.VMEM((TB * N, dpi), jnp.float32),    # X carried across k
            pltpu.VMEM((TB * N, dpi), jnp.bfloat16),   # hop features A^p X
            pltpu.VMEM((TB * N, dpo), jnp.float32),    # GCN accumulator
            pltpu.SemaphoreType.DMA(()),               # one-shot X0 DMA
        ],
        compiler_params=pltpu.CompilerParams(
            dimension_semantics=("parallel", "arbitrary"),
            vmem_limit_bytes=vmem_limit),
    )(A_bf, theta_packed, gb_packed, Wcat, bcat, Xp)

    out = out.reshape(K, B, N, dpo)
    # TODO(synk): at production sizes make dout a multiple of 128 (or let the
    # consumer take the padded slab) so this slice (an extra HBM pass) vanishes.
    return out[..., :dout].astype(jnp.float32)         # (K, B, N, dout)


def mgcn_reference(X, A, params, K):
    """Pure-JAX reference of the same (guessed) semantics, f32 throughout."""
    outs = []
    for k in range(K):
        th = params['gcn_theta'][k]
        H = X
        acc = jnp.einsum('bnd,de->bne', H, th[0])
        for p in range(1, k + 1):
            H = jnp.einsum('nm,bmd->bnd', A, H)
            acc = acc + jnp.einsum('bnd,de->bne', H, th[p])
        G = jax.nn.relu(acc + params['gcn_bias'][k])
        X = jnp.einsum('bne,de->bnd', G, params['W_lin']) + params['b_lin']
        X1 = jax.nn.sigmoid(jnp.einsum('bnd,de->bne', X, params['W']) + params['b'])
        outs.append(X1)
    return jnp.stack(outs)


def make_params(key, K, din, dout):
    """Deterministic synthetic parameters matching the module's __init__ shapes."""
    keys = jax.random.split(key, 4 + 2 * K)
    s = 0.1
    params = {
        'W_lin': s * jax.random.normal(keys[0], (din, dout), jnp.float32),  # Linear(dout, din).weight
        'b_lin': s * jax.random.normal(keys[1], (din,), jnp.float32),
        'W':     s * jax.random.normal(keys[2], (din, dout), jnp.float32),
        'b':     s * jax.random.normal(keys[3], (dout,), jnp.float32),
        'gcn_theta': [],
        'gcn_bias': [],
    }
    for k in range(K):
        params['gcn_theta'].append(
            s * jax.random.normal(keys[4 + 2 * k], (k + 1, din, dout), jnp.float32))
        params['gcn_bias'].append(
            s * jax.random.normal(keys[5 + 2 * k], (dout,), jnp.float32))
    return params


if __name__ == "__main__":
    # Small shapes consistent with the module's forward: X is (batch, N, dim_in_node).
    # B=16, N=16 so the auto batch tile gives TB*N = 128 MXU rows with 2 batch tiles.
    B, N = 16, 16
    din, dout = 8, 16          # dim_in_node, dim_out_node
    K = 3                      # range_K

    key = jax.random.PRNGKey(0)
    kx, ka, kp = jax.random.split(key, 3)

    X = jax.random.normal(kx, (B, N, din), jnp.float32)

    # Random adjacency, row-normalized (typical GCN preprocessing).
    A_raw = jax.random.uniform(ka, (N, N), jnp.float32)
    A = A_raw / jnp.sum(A_raw, axis=1, keepdims=True)

    params = make_params(kp, K, din, dout)

    fwd = jax.jit(functools.partial(mgcn_forward, K=K))
    out = jax.block_until_ready(fwd(X, A, params))
    assert out.shape == (K, B, N, dout), out.shape

    ref = mgcn_reference(X, A, params, K)
    assert bool(jnp.allclose(out, ref, atol=5e-2, rtol=5e-2)), float(
        jnp.max(jnp.abs(out - ref)))

    print("KERNEL_OK")
</pallas_src>

<mosaic_0001>
module attributes {stable_mosaic.version = 11 : i64} {
  func.func @_mgcn_fused_kernel(%arg0: i32, %arg1: i32, %arg2: memref<16x16xbf16, #tpu.memory_space<vmem>>, %arg3: memref<3x384x128xbf16, #tpu.memory_space<vmem>>, %arg4: memref<3x1x128xf32, #tpu.memory_space<vmem>>, %arg5: memref<128x256xbf16, #tpu.memory_space<vmem>>, %arg6: memref<1x256xf32, #tpu.memory_space<vmem>>, %arg7: memref<256x128xf32, #tpu.memory_space<any>>, %arg8: memref<1x128x128xf32, #tpu.memory_space<vmem>>, %arg9: memref<128x128xf32, #tpu.memory_space<vmem>>, %arg10: memref<128x128xbf16, #tpu.memory_space<vmem>>, %arg11: memref<128x128xf32, #tpu.memory_space<vmem>>, %arg12: memref<!tpu.dma_semaphore, #tpu.memory_space<semaphore_mem>>) attributes {dimension_semantics = [#tpu.dimension_semantics<parallel>, #tpu.dimension_semantics<arbitrary>], iteration_bounds = array<i64: 2, 3>, scalar_prefetch = 0 : i64, scratch_operands = 4 : i64, tpu.core_type = #tpu.core_type<tc>, window_params = [{pipeline_mode = #tpu.pipeline_mode<synchronous>, transform_indices = @transform_0, window_bounds = array<i64: 16, 16>}, {pipeline_mode = #tpu.pipeline_mode<synchronous>, transform_indices = @transform_1, window_bounds = array<i64: 3, 384, 128>}, {pipeline_mode = #tpu.pipeline_mode<synchronous>, transform_indices = @transform_2, window_bounds = array<i64: 3, 1, 128>}, {pipeline_mode = #tpu.pipeline_mode<synchronous>, transform_indices = @transform_3, window_bounds = array<i64: 128, 256>}, {pipeline_mode = #tpu.pipeline_mode<synchronous>, transform_indices = @transform_4, window_bounds = array<i64: 1, 256>}, {}, {transform_indices = @transform_6, window_bounds = array<i64: 1, 128, 128>}]} {
    %c0_i32 = arith.constant 0 : i32
    %0 = arith.cmpi eq, %arg1, %c0_i32 : i32
    %1 = arith.extui %0 : i1 to i32
    %c0_i32_0 = arith.constant 0 : i32
    %2 = arith.cmpi ne, %1, %c0_i32_0 : i32
    scf.if %2 {
      %c128_i32 = arith.constant 128 : i32
      %43 = arith.muli %arg0, %c128_i32 : i32
      %44 = tpu.assume_multiple %43, 128 : i32
      %c0_i32_27 = arith.constant 0 : i32
      %45 = tpu.memref_slice %arg7[%44, %c0_i32_27] : memref<256x128xf32, #tpu.memory_space<any>> -> memref<128x128xf32, #tpu.memory_space<any>>
      tpu.enqueue_dma source(%45 : memref<128x128xf32, #tpu.memory_space<any>>) target(%arg9 : memref<128x128xf32, #tpu.memory_space<vmem>>) target_semaphore(%arg12 : memref<!tpu.dma_semaphore, #tpu.memory_space<semaphore_mem>>)
      %c0_i32_28 = arith.constant 0 : i32
      %46 = tpu.memref_slice %arg7[%44, %c0_i32_28] : memref<256x128xf32, #tpu.memory_space<any>> -> memref<128x128xf32, #tpu.memory_space<any>>
      tpu.wait_dma2 semaphore(%arg12 : memref<!tpu.dma_semaphore, #tpu.memory_space<semaphore_mem>>) src(%46 : memref<128x128xf32, #tpu.memory_space<any>>) dst(%arg9 : memref<128x128xf32, #tpu.memory_space<vmem>>)
    } else {
    }
    %c0 = arith.constant 0 : index
    %c0_1 = arith.constant 0 : index
    %3 = vector.load %arg9[%c0, %c0_1] : memref<128x128xf32, #tpu.memory_space<vmem>>, vector<128x128xf32>
    %4 = arith.truncf %3 : vector<128x128xf32> to vector<128x128xbf16>
    %c0_2 = arith.constant 0 : index
    %c0_3 = arith.constant 0 : index
    %5 = vector.load %arg10[%c0_2, %c0_3] : memref<128x128xbf16, #tpu.memory_space<vmem>>, vector<128x128xbf16>
    tpu.vector_store %arg10[%c0_2, %c0_3], %4 {strides = array<i32>} : memref<128x128xbf16, #tpu.memory_space<vmem>>, vector<128x128xbf16>,
    %6 = arith.index_cast %arg1 : i32 to index
    %c0_4 = arith.constant 0 : index
    %c0_5 = arith.constant 0 : index
    %7 = vector.load %arg3[%6, %c0_4, %c0_5] : memref<3x384x128xbf16, #tpu.memory_space<vmem>>, vector<1x128x128xbf16>
    %8 = vector.shape_cast %7 : vector<1x128x128xbf16> to vector<128x128xbf16>
    %cst = arith.constant dense<0.000000e+00> : vector<128x128xf32>
    %9 = tpu.matmul %4, %8, %cst {dimension_numbers = #tpu.dot_dimension_numbers<[1], [0], [0], [1], [0, 0, 1, 1], [], []>} : vector<128x128xbf16>, vector<128x128xbf16>, vector<128x128xf32> -> vector<128x128xf32>
    %c0_6 = arith.constant 0 : index
    %c0_7 = arith.constant 0 : index
    %10 = vector.load %arg11[%c0_6, %c0_7] : memref<128x128xf32, #tpu.memory_space<vmem>>, vector<128x128xf32>
    tpu.vector_store %arg11[%c0_6, %c0_7], %9 {strides = array<i32>} : memref<128x128xf32, #tpu.memory_space<vmem>>, vector<128x128xf32>,
    %c1_i32 = arith.constant 1 : i32
    %11 = arith.cmpi sge, %arg1, %c1_i32 : i32
    %12 = arith.extui %11 : i1 to i32
    %c0_i32_8 = arith.constant 0 : i32
    %13 = arith.cmpi ne, %12, %c0_i32_8 : i32
    scf.if %13 {
      %c0_27 = arith.constant 0 : index
      %c0_28 = arith.constant 0 : index
      %43 = vector.load %arg2[%c0_27, %c0_28] : memref<16x16xbf16, #tpu.memory_space<vmem>>, vector<16x16xbf16>
      %c0_29 = arith.constant 0 : index
      %c0_30 = arith.constant 0 : index
      %44 = vector.load %arg10[%c0_29, %c0_30] : memref<128x128xbf16, #tpu.memory_space<vmem>>, vector<16x128xbf16>
      %cst_31 = arith.constant dense<0.000000e+00> : vector<16x128xf32>
      %45 = tpu.matmul %43, %44, %cst_31 {dimension_numbers = #tpu.dot_dimension_numbers<[1], [0], [0], [1], [0, 0, 1, 1], [], []>} : vector<16x16xbf16>, vector<16x128xbf16>, vector<16x128xf32> -> vector<16x128xf32>
      %46 = arith.truncf %45 : vector<16x128xf32> to vector<16x128xbf16>
      %c0_32 = arith.constant 0 : index
      %c0_33 = arith.constant 0 : index
      %47 = vector.load %arg10[%c0_32, %c0_33] : memref<128x128xbf16, #tpu.memory_space<vmem>>, vector<16x128xbf16>
      tpu.vector_store %arg10[%c0_32, %c0_33], %46 {strides = array<i32>} : memref<128x128xbf16, #tpu.memory_space<vmem>>, vector<16x128xbf16>,
      %c16 = arith.constant 16 : index
      %c0_34 = arith.constant 0 : index
      %48 = vector.load %arg10[%c16, %c0_34] : memref<128x128xbf16, #tpu.memory_space<vmem>>, vector<16x128xbf16>
      %cst_35 = arith.constant dense<0.000000e+00> : vector<16x128xf32>
      %49 = tpu.matmul %43, %48, %cst_35 {dimension_numbers = #tpu.dot_dimension_numbers<[1], [0], [0], [1], [0, 0, 1, 1], [], []>} : vector<16x16xbf16>, vector<16x128xbf16>, vector<16x128xf32> -> vector<16x128xf32>
      %50 = arith.truncf %49 : vector<16x128xf32> to vector<16x128xbf16>
      %c16_36 = arith.constant 16 : index
      %c0_37 = arith.constant 0 : index
      %51 = vector.load %arg10[%c16_36, %c0_37] : memref<128x128xbf16, #tpu.memory_space<vmem>>, vector<16x128xbf16>
      tpu.vector_store %arg10[%c16_36, %c0_37], %50 {strides = array<i32>} : memref<128x128xbf16, #tpu.memory_space<vmem>>, vector<16x128xbf16>,
      %c32 = arith.constant 32 : index
      %c0_38 = arith.constant 0 : index
      %52 = vector.load %arg10[%c32, %c0_38] : memref<128x128xbf16, #tpu.memory_space<vmem>>, vector<16x128xbf16>
      %cst_39 = arith.constant dense<0.000000e+00> : vector<16x128xf32>
      %53 = tpu.matmul %43, %52, %cst_39 {dimension_numbers = #tpu.dot_dimension_numbers<[1], [0], [0], [1], [0, 0, 1, 1], [], []>} : vector<16x16xbf16>, vector<16x128xbf16>, vector<16x128xf32> -> vector<16x128xf32>
      %54 = arith.truncf %53 : vector<16x128xf32> to vector<16x128xbf16>
      %c32_40 = arith.constant 32 : index
      %c0_41 = arith.constant 0 : index
      %55 = vector.load %arg10[%c32_40, %c0_41] : memref<128x128xbf16, #tpu.memory_space<vmem>>, vector<16x128xbf16>
      tpu.vector_store %arg10[%c32_40, %c0_41], %54 {strides = array<i32>} : memref<128x128xbf16, #tpu.memory_space<vmem>>, vector<16x128xbf16>,
      %c48 = arith.constant 48 : index
      %c0_42 = arith.constant 0 : index
      %56 = vector.load %arg10[%c48, %c0_42] : memref<128x128xbf16, #tpu.memory_space<vmem>>, vector<16x128xbf16>
      %cst_43 = arith.constant dense<0.000000e+00> : vector<16x128xf32>
      %57 = tpu.matmul %43, %56, %cst_43 {dimension_numbers = #tpu.dot_dimension_numbers<[1], [0], [0], [1], [0, 0, 1, 1], [], []>} : vector<16x16xbf16>, vector<16x128xbf16>, vector<16x128xf32> -> vector<16x128xf32>
      %58 = arith.truncf %57 : vector<16x128xf32> to vector<16x128xbf16>
      %c48_44 = arith.constant 48 : index
      %c0_45 = arith.constant 0 : index
      %59 = vector.load %arg10[%c48_44, %c0_45] : memref<128x128xbf16, #tpu.memory_space<vmem>>, vector<16x128xbf16>
      tpu.vector_store %arg10[%c48_44, %c0_45], %58 {strides = array<i32>} : memref<128x128xbf16, #tpu.memory_space<vmem>>, vector<16x128xbf16>,
      %c64 = arith.constant 64 : index
      %c0_46 = arith.constant 0 : index
      %60 = vector.load %arg10[%c64, %c0_46] : memref<128x128xbf16, #tpu.memory_space<vmem>>, vector<16x128xbf16>
      %cst_47 = arith.constant dense<0.000000e+00> : vector<16x128xf32>
      %61 = tpu.matmul %43, %60, %cst_47 {dimension_numbers = #tpu.dot_dimension_numbers<[1], [0], [0], [1], [0, 0, 1, 1], [], []>} : vector<16x16xbf16>, vector<16x128xbf16>, vector<16x128xf32> -> vector<16x128xf32>
      %62 = arith.truncf %61 : vector<16x128xf32> to vector<16x128xbf16>
      %c64_48 = arith.constant 64 : index
      %c0_49 = arith.constant 0 : index
      %63 = vector.load %arg10[%c64_48, %c0_49] : memref<128x128xbf16, #tpu.memory_space<vmem>>, vector<16x128xbf16>
      tpu.vector_store %arg10[%c64_48, %c0_49], %62 {strides = array<i32>} : memref<128x128xbf16, #tpu.memory_space<vmem>>, vector<16x128xbf16>,
      %c80 = arith.constant 80 : index
      %c0_50 = arith.constant 0 : index
      %64 = vector.load %arg10[%c80, %c0_50] : memref<128x128xbf16, #tpu.memory_space<vmem>>, vector<16x128xbf16>
      %cst_51 = arith.constant dense<0.000000e+00> : vector<16x128xf32>
      %65 = tpu.matmul %43, %64, %cst_51 {dimension_numbers = #tpu.dot_dimension_numbers<[1], [0], [0], [1], [0, 0, 1, 1], [], []>} : vector<16x16xbf16>, vector<16x128xbf16>, vector<16x128xf32> -> vector<16x128xf32>
      %66 = arith.truncf %65 : vector<16x128xf32> to vector<16x128xbf16>
      %c80_52 = arith.constant 80 : index
      %c0_53 = arith.constant 0 : index
      %67 = vector.load %arg10[%c80_52, %c0_53] : memref<128x128xbf16, #tpu.memory_space<vmem>>, vector<16x128xbf16>
      tpu.vector_store %arg10[%c80_52, %c0_53], %66 {strides = array<i32>} : memref<128x128xbf16, #tpu.memory_space<vmem>>, vector<16x128xbf16>,
      %c96 = arith.constant 96 : index
      %c0_54 = arith.constant 0 : index
      %68 = vector.load %arg10[%c96, %c0_54] : memref<128x128xbf16, #tpu.memory_space<vmem>>, vector<16x128xbf16>
      %cst_55 = arith.constant dense<0.000000e+00> : vector<16x128xf32>
      %69 = tpu.matmul %43, %68, %cst_55 {dimension_numbers = #tpu.dot_dimension_numbers<[1], [0], [0], [1], [0, 0, 1, 1], [], []>} : vector<16x16xbf16>, vector<16x128xbf16>, vector<16x128xf32> -> vector<16x128xf32>
      %70 = arith.truncf %69 : vector<16x128xf32> to vector<16x128xbf16>
      %c96_56 = arith.constant 96 : index
      %c0_57 = arith.constant 0 : index
      %71 = vector.load %arg10[%c96_56, %c0_57] : memref<128x128xbf16, #tpu.memory_space<vmem>>, vector<16x128xbf16>
      tpu.vector_store %arg10[%c96_56, %c0_57], %70 {strides = array<i32>} : memref<128x128xbf16, #tpu.memory_space<vmem>>, vector<16x128xbf16>,
      %c112 = arith.constant 112 : index
      %c0_58 = arith.constant 0 : index
      %72 = vector.load %arg10[%c112, %c0_58] : memref<128x128xbf16, #tpu.memory_space<vmem>>, vector<16x128xbf16>
      %cst_59 = arith.constant dense<0.000000e+00> : vector<16x128xf32>
      %73 = tpu.matmul %43, %72, %cst_59 {dimension_numbers = #tpu.dot_dimension_numbers<[1], [0], [0], [1], [0, 0, 1, 1], [], []>} : vector<16x16xbf16>, vector<16x128xbf16>, vector<16x128xf32> -> vector<16x128xf32>
      %74 = arith.truncf %73 : vector<16x128xf32> to vector<16x128xbf16>
      %c112_60 = arith.constant 112 : index
      %c0_61 = arith.constant 0 : index
      %75 = vector.load %arg10[%c112_60, %c0_61] : memref<128x128xbf16, #tpu.memory_space<vmem>>, vector<16x128xbf16>
      tpu.vector_store %arg10[%c112_60, %c0_61], %74 {strides = array<i32>} : memref<128x128xbf16, #tpu.memory_space<vmem>>, vector<16x128xbf16>,
      %c0_62 = arith.constant 0 : index
      %c0_63 = arith.constant 0 : index
      %76 = vector.load %arg11[%c0_62, %c0_63] : memref<128x128xf32, #tpu.memory_space<vmem>>, vector<128x128xf32>
      %c0_64 = arith.constant 0 : index
      %c0_65 = arith.constant 0 : index
      %77 = vector.load %arg10[%c0_64, %c0_65] : memref<128x128xbf16, #tpu.memory_space<vmem>>, vector<128x128xbf16>
      %78 = arith.index_cast %arg1 : i32 to index
      %c128 = arith.constant 128 : index
      %c0_66 = arith.constant 0 : index
      %79 = vector.load %arg3[%78, %c128, %c0_66] : memref<3x384x128xbf16, #tpu.memory_space<vmem>>, vector<1x128x128xbf16>
      %80 = vector.shape_cast %79 : vector<1x128x128xbf16> to vector<128x128xbf16>
      %cst_67 = arith.constant dense<0.000000e+00> : vector<128x128xf32>
      %81 = tpu.matmul %77, %80, %cst_67 {dimension_numbers = #tpu.dot_dimension_numbers<[1], [0], [0], [1], [0, 0, 1, 1], [], []>} : vector<128x128xbf16>, vector<128x128xbf16>, vector<128x128xf32> -> vector<128x128xf32>
      %82 = arith.addf %76, %81 : vector<128x128xf32>
      %c0_68 = arith.constant 0 : index
      %c0_69 = arith.constant 0 : index
      %83 = vector.load %arg11[%c0_68, %c0_69] : memref<128x128xf32, #tpu.memory_space<vmem>>, vector<128x128xf32>
      tpu.vector_store %arg11[%c0_68, %c0_69], %82 {strides = array<i32>} : memref<128x128xf32, #tpu.memory_space<vmem>>, vector<128x128xf32>,
    } else {
    }
    %c2_i32 = arith.constant 2 : i32
    %14 = arith.cmpi sge, %arg1, %c2_i32 : i32
    %15 = arith.extui %14 : i1 to i32
    %c0_i32_9 = arith.constant 0 : i32
    %16 = arith.cmpi ne, %15, %c0_i32_9 : i32
    scf.if %16 {
      %c0_27 = arith.constant 0 : index
      %c0_28 = arith.constant 0 : index
      %43 = vector.load %arg2[%c0_27, %c0_28] : memref<16x16xbf16, #tpu.memory_space<vmem>>, vector<16x16xbf16>
      %c0_29 = arith.constant 0 : index
      %c0_30 = arith.constant 0 : index
      %44 = vector.load %arg10[%c0_29, %c0_30] : memref<128x128xbf16, #tpu.memory_space<vmem>>, vector<16x128xbf16>
      %cst_31 = arith.constant dense<0.000000e+00> : vector<16x128xf32>
      %45 = tpu.matmul %43, %44, %cst_31 {dimension_numbers = #tpu.dot_dimension_numbers<[1], [0], [0], [1], [0, 0, 1, 1], [], []>} : vector<16x16xbf16>, vector<16x128xbf16>, vector<16x128xf32> -> vector<16x128xf32>
      %46 = arith.truncf %45 : vector<16x128xf32> to vector<16x128xbf16>
      %c0_32 = arith.constant 0 : index
      %c0_33 = arith.constant 0 : index
      %47 = vector.load %arg10[%c0_32, %c0_33] : memref<128x128xbf16, #tpu.memory_space<vmem>>, vector<16x128xbf16>
      tpu.vector_store %arg10[%c0_32, %c0_33], %46 {strides = array<i32>} : memref<128x128xbf16, #tpu.memory_space<vmem>>, vector<16x128xbf16>,
      %c16 = arith.constant 16 : index
      %c0_34 = arith.constant 0 : index
      %48 = vector.load %arg10[%c16, %c0_34] : memref<128x128xbf16, #tpu.memory_space<vmem>>, vector<16x128xbf16>
      %cst_35 = arith.constant dense<0.000000e+00> : vector<16x128xf32>
      %49 = tpu.matmul %43, %48, %cst_35 {dimension_numbers = #tpu.dot_dimension_numbers<[1], [0], [0], [1], [0, 0, 1, 1], [], []>} : vector<16x16xbf16>, vector<16x128xbf16>, vector<16x128xf32> -> vector<16x128xf32>
      %50 = arith.truncf %49 : vector<16x128xf32> to vector<16x128xbf16>
      %c16_36 = arith.constant 16 : index
      %c0_37 = arith.constant 0 : index
      %51 = vector.load %arg10[%c16_36, %c0_37] : memref<128x128xbf16, #tpu.memory_space<vmem>>, vector<16x128xbf16>
      tpu.vector_store %arg10[%c16_36, %c0_37], %50 {strides = array<i32>} : memref<128x128xbf16, #tpu.memory_space<vmem>>, vector<16x128xbf16>,
      %c32 = arith.constant 32 : index
      %c0_38 = arith.constant 0 : index
      %52 = vector.load %arg10[%c32, %c0_38] : memref<128x128xbf16, #tpu.memory_space<vmem>>, vector<16x128xbf16>
      %cst_39 = arith.constant dense<0.000000e+00> : vector<16x128xf32>
      %53 = tpu.matmul %43, %52, %cst_39 {dimension_numbers = #tpu.dot_dimension_numbers<[1], [0], [0], [1], [0, 0, 1, 1], [], []>} : vector<16x16xbf16>, vector<16x128xbf16>, vector<16x128xf32> -> vector<16x128xf32>
      %54 = arith.truncf %53 : vector<16x128xf32> to vector<16x128xbf16>
      %c32_40 = arith.constant 32 : index
      %c0_41 = arith.constant 0 : index
      %55 = vector.load %arg10[%c32_40, %c0_41] : memref<128x128xbf16, #tpu.memory_space<vmem>>, vector<16x128xbf16>
      tpu.vector_store %arg10[%c32_40, %c0_41], %54 {strides = array<i32>} : memref<128x128xbf16, #tpu.memory_space<vmem>>, vector<16x128xbf16>,
      %c48 = arith.constant 48 : index
      %c0_42 = arith.constant 0 : index
      %56 = vector.load %arg10[%c48, %c0_42] : memref<128x128xbf16, #tpu.memory_space<vmem>>, vector<16x128xbf16>
      %cst_43 = arith.constant dense<0.000000e+00> : vector<16x128xf32>
      %57 = tpu.matmul %43, %56, %cst_43 {dimension_numbers = #tpu.dot_dimension_numbers<[1], [0], [0], [1], [0, 0, 1, 1], [], []>} : vector<16x16xbf16>, vector<16x128xbf16>, vector<16x128xf32> -> vector<16x128xf32>
      %58 = arith.truncf %57 : vector<16x128xf32> to vector<16x128xbf16>
      %c48_44 = arith.constant 48 : index
      %c0_45 = arith.constant 0 : index
      %59 = vector.load %arg10[%c48_44, %c0_45] : memref<128x128xbf16, #tpu.memory_space<vmem>>, vector<16x128xbf16>
      tpu.vector_store %arg10[%c48_44, %c0_45], %58 {strides = array<i32>} : memref<128x128xbf16, #tpu.memory_space<vmem>>, vector<16x128xbf16>,
      %c64 = arith.constant 64 : index
      %c0_46 = arith.constant 0 : index
      %60 = vector.load %arg10[%c64, %c0_46] : memref<128x128xbf16, #tpu.memory_space<vmem>>, vector<16x128xbf16>
      %cst_47 = arith.constant dense<0.000000e+00> : vector<16x128xf32>
      %61 = tpu.matmul %43, %60, %cst_47 {dimension_numbers = #tpu.dot_dimension_numbers<[1], [0], [0], [1], [0, 0, 1, 1], [], []>} : vector<16x16xbf16>, vector<16x128xbf16>, vector<16x128xf32> -> vector<16x128xf32>
      %62 = arith.truncf %61 : vector<16x128xf32> to vector<16x128xbf16>
      %c64_48 = arith.constant 64 : index
      %c0_49 = arith.constant 0 : index
      %63 = vector.load %arg10[%c64_48, %c0_49] : memref<128x128xbf16, #tpu.memory_space<vmem>>, vector<16x128xbf16>
      tpu.vector_store %arg10[%c64_48, %c0_49], %62 {strides = array<i32>} : memref<128x128xbf16, #tpu.memory_space<vmem>>, vector<16x128xbf16>,
      %c80 = arith.constant 80 : index
      %c0_50 = arith.constant 0 : index
      %64 = vector.load %arg10[%c80, %c0_50] : memref<128x128xbf16, #tpu.memory_space<vmem>>, vector<16x128xbf16>
      %cst_51 = arith.constant dense<0.000000e+00> : vector<16x128xf32>
      %65 = tpu.matmul %43, %64, %cst_51 {dimension_numbers = #tpu.dot_dimension_numbers<[1], [0], [0], [1], [0, 0, 1, 1], [], []>} : vector<16x16xbf16>, vector<16x128xbf16>, vector<16x128xf32> -> vector<16x128xf32>
      %66 = arith.truncf %65 : vector<16x128xf32> to vector<16x128xbf16>
      %c80_52 = arith.constant 80 : index
      %c0_53 = arith.constant 0 : index
      %67 = vector.load %arg10[%c80_52, %c0_53] : memref<128x128xbf16, #tpu.memory_space<vmem>>, vector<16x128xbf16>
      tpu.vector_store %arg10[%c80_52, %c0_53], %66 {strides = array<i32>} : memref<128x128xbf16, #tpu.memory_space<vmem>>, vector<16x128xbf16>,
      %c96 = arith.constant 96 : index
      %c0_54 = arith.constant 0 : index
      %68 = vector.load %arg10[%c96, %c0_54] : memref<128x128xbf16, #tpu.memory_space<vmem>>, vector<16x128xbf16>
      %cst_55 = arith.constant dense<0.000000e+00> : vector<16x128xf32>
      %69 = tpu.matmul %43, %68, %cst_55 {dimension_numbers = #tpu.dot_dimension_numbers<[1], [0], [0], [1], [0, 0, 1, 1], [], []>} : vector<16x16xbf16>, vector<16x128xbf16>, vector<16x128xf32> -> vector<16x128xf32>
      %70 = arith.truncf %69 : vector<16x128xf32> to vector<16x128xbf16>
      %c96_56 = arith.constant 96 : index
      %c0_57 = arith.constant 0 : index
      %71 = vector.load %arg10[%c96_56, %c0_57] : memref<128x128xbf16, #tpu.memory_space<vmem>>, vector<16x128xbf16>
      tpu.vector_store %arg10[%c96_56, %c0_57], %70 {strides = array<i32>} : memref<128x128xbf16, #tpu.memory_space<vmem>>, vector<16x128xbf16>,
      %c112 = arith.constant 112 : index
      %c0_58 = arith.constant 0 : index
      %72 = vector.load %arg10[%c112, %c0_58] : memref<128x128xbf16, #tpu.memory_space<vmem>>, vector<16x128xbf16>
      %cst_59 = arith.constant dense<0.000000e+00> : vector<16x128xf32>
      %73 = tpu.matmul %43, %72, %cst_59 {dimension_numbers = #tpu.dot_dimension_numbers<[1], [0], [0], [1], [0, 0, 1, 1], [], []>} : vector<16x16xbf16>, vector<16x128xbf16>, vector<16x128xf32> -> vector<16x128xf32>
      %74 = arith.truncf %73 : vector<16x128xf32> to vector<16x128xbf16>
      %c112_60 = arith.constant 112 : index
      %c0_61 = arith.constant 0 : index
      %75 = vector.load %arg10[%c112_60, %c0_61] : memref<128x128xbf16, #tpu.memory_space<vmem>>, vector<16x128xbf16>
      tpu.vector_store %arg10[%c112_60, %c0_61], %74 {strides = array<i32>} : memref<128x128xbf16, #tpu.memory_space<vmem>>, vector<16x128xbf16>,
      %c0_62 = arith.constant 0 : index
      %c0_63 = arith.constant 0 : index
      %76 = vector.load %arg11[%c0_62, %c0_63] : memref<128x128xf32, #tpu.memory_space<vmem>>, vector<128x128xf32>
      %c0_64 = arith.constant 0 : index
      %c0_65 = arith.constant 0 : index
      %77 = vector.load %arg10[%c0_64, %c0_65] : memref<128x128xbf16, #tpu.memory_space<vmem>>, vector<128x128xbf16>
      %78 = arith.index_cast %arg1 : i32 to index
      %c256 = arith.constant 256 : index
      %c0_66 = arith.constant 0 : index
      %79 = vector.load %arg3[%78, %c256, %c0_66] : memref<3x384x128xbf16, #tpu.memory_space<vmem>>, vector<1x128x128xbf16>
      %80 = vector.shape_cast %79 : vector<1x128x128xbf16> to vector<128x128xbf16>
      %cst_67 = arith.constant dense<0.000000e+00> : vector<128x128xf32>
      %81 = tpu.matmul %77, %80, %cst_67 {dimension_numbers = #tpu.dot_dimension_numbers<[1], [0], [0], [1], [0, 0, 1, 1], [], []>} : vector<128x128xbf16>, vector<128x128xbf16>, vector<128x128xf32> -> vector<128x128xf32>
      %82 = arith.addf %76, %81 : vector<128x128xf32>
      %c0_68 = arith.constant 0 : index
      %c0_69 = arith.constant 0 : index
      %83 = vector.load %arg11[%c0_68, %c0_69] : memref<128x128xf32, #tpu.memory_space<vmem>>, vector<128x128xf32>
      tpu.vector_store %arg11[%c0_68, %c0_69], %82 {strides = array<i32>} : memref<128x128xf32, #tpu.memory_space<vmem>>, vector<128x128xf32>,
    } else {
    }
    %c0_10 = arith.constant 0 : index
    %c0_11 = arith.constant 0 : index
    %17 = vector.load %arg11[%c0_10, %c0_11] : memref<128x128xf32, #tpu.memory_space<vmem>>, vector<128x128xf32>
    %18 = arith.index_cast %arg1 : i32 to index
    %c0_12 = arith.constant 0 : index
    %c0_13 = arith.constant 0 : index
    %19 = vector.load %arg4[%18, %c0_12, %c0_13] : memref<3x1x128xf32, #tpu.memory_space<vmem>>, vector<1x1x128xf32>
    %20 = vector.shape_cast %19 : vector<1x1x128xf32> to vector<1x128xf32>
    %21 = vector.broadcast %20 : vector<1x128xf32> to vector<128x128xf32>
    %22 = arith.addf %17, %21 : vector<128x128xf32>
    %cst_14 = arith.constant 0.000000e+00 : f32
    %23 = vector.broadcast %cst_14 : f32 to vector<128x128xf32>
    %24 = arith.maximumf %22, %23 : vector<128x128xf32>
    %25 = arith.truncf %24 : vector<128x128xf32> to vector<128x128xbf16>
    %c0_15 = arith.constant 0 : index
    %c0_16 = arith.constant 0 : index
    %26 = vector.load %arg5[%c0_15, %c0_16] : memref<128x256xbf16, #tpu.memory_space<vmem>>, vector<128x256xbf16>
    %cst_17 = arith.constant dense<0.000000e+00> : vector<128x256xf32>
    %27 = tpu.matmul %25, %26, %cst_17 {dimension_numbers = #tpu.dot_dimension_numbers<[1], [0], [0], [1], [0, 0, 1, 1], [], []>} : vector<128x128xbf16>, vector<128x256xbf16>, vector<128x256xf32> -> vector<128x256xf32>
    %c0_18 = arith.constant 0 : index
    %c0_19 = arith.constant 0 : index
    %28 = vector.load %arg6[%c0_18, %c0_19] : memref<1x256xf32, #tpu.memory_space<vmem>>, vector<1x256xf32>
    %29 = vector.broadcast %28 : vector<1x256xf32> to vector<128x256xf32>
    %30 = arith.addf %27, %29 : vector<128x256xf32>
    %31 = vector.extract_strided_slice %30 {offsets = [0, 0], sizes = [128, 128], strides = [1, 1]} : vector<128x256xf32> to vector<128x128xf32>
    %c0_20 = arith.constant 0 : index
    %c0_21 = arith.constant 0 : index
    %32 = vector.load %arg9[%c0_20, %c0_21] : memref<128x128xf32, #tpu.memory_space<vmem>>, vector<128x128xf32>
    tpu.vector_store %arg9[%c0_20, %c0_21], %31 {strides = array<i32>} : memref<128x128xf32, #tpu.memory_space<vmem>>, vector<128x128xf32>,
    %33 = vector.extract_strided_slice %30 {offsets = [0, 128], sizes = [128, 128], strides = [1, 1]} : vector<128x256xf32> to vector<128x128xf32>
    %cst_22 = arith.constant 0.000000e+00 : f32
    %34 = vector.broadcast %cst_22 : f32 to vector<128x128xf32>
    %35 = arith.subf %34, %33 : vector<128x128xf32>
    %36 = math.exp %35 : vector<128x128xf32>
    %cst_23 = arith.constant 1.000000e+00 : f32
    %37 = vector.broadcast %cst_23 : f32 to vector<128x128xf32>
    %38 = arith.addf %37, %36 : vector<128x128xf32>
    %39 = tpu.reciprocal %38 {approx = true} : vector<128x128xf32> -> vector<128x128xf32>
    %c0_24 = arith.constant 0 : index
    %c0_25 = arith.constant 0 : index
    %c0_26 = arith.constant 0 : index
    %40 = vector.load %arg8[%c0_24, %c0_25, %c0_26] : memref<1x128x128xf32, #tpu.memory_space<vmem>>, vector<1x128x128xf32>
    %41 = vector.shape_cast %40 : vector<1x128x128xf32> to vector<128x128xf32>
    %42 = vector.shape_cast %39 : vector<128x128xf32> to vector<1x128x128xf32>
    tpu.vector_store %arg8[%c0_24, %c0_25, %c0_26], %42 {strides = array<i32>} : memref<1x128x128xf32, #tpu.memory_space<vmem>>, vector<1x128x128xf32>,
    return
  }
  func.func @transform_0(%arg0: i32, %arg1: i32) -> (i32, i32) {
    %c0_i32 = arith.constant 0 : i32
    %c0_i32_0 = arith.constant 0 : i32
    %c0_i32_1 = arith.constant 0 : i32
    return %c0_i32, %c0_i32_0 : i32, i32
  }
  func.func @transform_1(%arg0: i32, %arg1: i32) -> (i32, i32, i32) {
    %c0_i32 = arith.constant 0 : i32
    %c0_i32_0 = arith.constant 0 : i32
    %c0_i32_1 = arith.constant 0 : i32
    %c0_i32_2 = arith.constant 0 : i32
    return %c0_i32, %c0_i32_0, %c0_i32_1 : i32, i32, i32
  }
  func.func @transform_2(%arg0: i32, %arg1: i32) -> (i32, i32, i32) {
    %c0_i32 = arith.constant 0 : i32
    %c0_i32_0 = arith.constant 0 : i32
    %c0_i32_1 = arith.constant 0 : i32
    %c0_i32_2 = arith.constant 0 : i32
    return %c0_i32, %c0_i32_0, %c0_i32_1 : i32, i32, i32
  }
  func.func @transform_3(%arg0: i32, %arg1: i32) -> (i32, i32) {
    %c0_i32 = arith.constant 0 : i32
    %c0_i32_0 = arith.constant 0 : i32
    %c0_i32_1 = arith.constant 0 : i32
    return %c0_i32, %c0_i32_0 : i32, i32
  }
  func.func @transform_4(%arg0: i32, %arg1: i32) -> (i32, i32) {
    %c0_i32 = arith.constant 0 : i32
    %c0_i32_0 = arith.constant 0 : i32
    %c0_i32_1 = arith.constant 0 : i32
    return %c0_i32, %c0_i32_0 : i32, i32
  }
  func.func @transform_6(%arg0: i32, %arg1: i32) -> (i32, i32, i32) {
    %c0_i32 = arith.constant 0 : i32
    %c0_i32_0 = arith.constant 0 : i32
    return %arg1, %arg0, %c0_i32 : i32, i32, i32
  }
}

</mosaic_0001>

<bundles_post_ra>
// kernel: mgcn_forward.1
= control target key start
LH: loop header
LB: loop body
LE: loop exit
PB: predicated region body
PF: predicated region fallthrough
CT: control target
= control target key end

     0   :  { %s4008_s0 = inlined_call_operand.vmem [shape: bf16[16,16], index: 0, kind: input, shape index: {}]   ;;  %s4009_s1 = inlined_call_operand.vmem [shape: bf16[3,384,128], index: 1, kind: input, shape index: {}]   ;;  %s4010_s2 = inlined_call_operand.vmem [shape: f32[3,1,128], index: 2, kind: input, shape index: {}]   ;;  %s4011_s3 = inlined_call_operand.vmem [shape: bf16[128,256], index: 3, kind: input, shape index: {}]   ;;  %s4012_s4 = inlined_call_operand.vmem [shape: f32[1,256], index: 4, kind: input, shape index: {}]   ;;  %s4013_s5 = inlined_call_operand.vmem [shape: f32[256,128], index: 5, kind: input, shape index: {}]   ;;  %s4014_s6 = inlined_call_operand.hbm [shape: f32[3,256,128], index: 6, kind: output, shape index: {}]  }
   0x1   :  { %4016 = sst [smem:[#allocation11_spill]] %s4008_s0 }
   0x2   :  { %11 = vsyncpa [#allocation7], 0 }
   0x3   :  { %13 = vsyncpa [#allocation7 + $0x1], 0  ;;  %s3639_s21 = smov 0   ;;  %s3641_s22 = smov 0  }
   0x4   :  { %s3643_s23 = smov 0   ;;  %s3645_s24 = smov 0  }
   0x5   :  { %s3647_s25 = smov 0   ;;  %s3649_s26 = smov 0  }
   0x6   :  { %s3651_s27 = smov 0   ;;  %s3653_s28 = smov 0  }
   0x7 LB: > { %s2594_s29 = sadd.s32 4294967295, %s3594_s28   ;;  %s2595_s30 = sadd.s32 4294967294, %s3594_s28   ;;  %s3594_s28 = sphi %s3653_s28, %s19_s28   ;;  %s3590_s27 = sphi %s3651_s27, %s4028_s27   ;;  %s3586_s26 = sphi %s3649_s26, %s4027_s26   ;;  %s3582_s25 = sphi %s3647_s25, %s4026_s25   ;;  %s3578_s24 = sphi %s3645_s24, %s4025_s24   ;;  %s3574_s23 = sphi %s3643_s23, %s4024_s23   ;;  %s3570_s22 = sphi %s3641_s22, %s4023_s22   ;;  %s3566_s21 = sphi %s3639_s21, %s4022_s21  }
   0x8   : > { %s28_s7 = sadd.s32 1, %s3586_s26  ;;  %s31_s8 = sadd.s32 1, %s3590_s27 }
   0x9   : > { %p29_p0 = scmp.ge.s32.totalorder %s28_s7, 3  ;;  %p155_p1 = scmp.ne.s32.totalorder %s3574_s23, %s3570_s22 }
   0xa   : > { %p156_p2 = scmp.eq.s32.totalorder %s2594_s29, 5  ;;  %p161_p5 = scmp.ne.s32.totalorder %s3570_s22, %s3566_s21 }
   0xb   : > { %s4030_s7 = smov (%p29_p0, %s28_s7), 0  ;;  %s4032_s8 = smov (!%p29_p0, %s31_s8), %s3590_s27 }
   0xc   : > { %s140_s9 = ssub.s32 %s3586_s26, %s4030_s7  ;;  %p3690_p3 = por %p156_p2, %p155_p1 }
   0xd   : > { %p33_p4 = scmp.ge.s32.totalorder %s4032_s8, 2  ;;  %p162_p6 = scmp.eq.s32.totalorder %s2595_s30, 5 }
   0xe   : > { %p2597_p7 = scmp.ge.s32.totalorder %s3594_s28, 1  ;;  %p195_p9 = scmp.lt.s32.totalorder %s3594_s28, 7 }
   0xf   : > { %s4034_s8 = smov (%p33_p4, %s4032_s8), 0  ;;  %p3699_p8 = por %p162_p6, %p161_p5 }
  0x10   : > { %s141_s12 = ssub.s32 %s3590_s27, %s4034_s8  ;;  %s145_s13 = sadd.s32 1, %s3574_s23 }
  0x11   : > { %s142_s14 = sor.u32 %s141_s12, %s140_s9  ;;  %p196_p10 = pnand %p2597_p7, %p195_p9 }
  0x12   : > { %p143_p11 = scmp.eq.s32.totalorder %s142_s14, 0  ;;  %s4015_s16 = sand.u32 (!%p196_p10), 1, %s3570_s22  }
  0x13   : > { %199 = sbr.rel (%p196_p10) target bundleno = 1481 (0x5c9), region = 40  ;;  %s2598_s17 = sshll.u32 (!%p196_p10), %s4015_s16, 7 }
  0x14   : > { %s3708_s15 = scalar_select %p143_p11, %s3574_s23, %s145_s13  }
  0x15   : > { %s3713_s18 = scalar_lea.vmem (!%p196_p10), [#allocation6], %s2598_s17  ;;  %p2599_p12 = scmp.ne.s32.totalorder (!%p196_p10), %s3578_s24, 0 }
  0x18   : > { %223 = sbr.rel (%p2599_p12) target bundleno = 41 (0x29), region = 44  ;;  %s2600_s19 = sshll.u32 (!%p2599_p12), %s3582_s25, 7 }
  0x19   : > { %s3720_s30 = scalar_lea.vmem (!%p2599_p12), %s4013_s5, %s2600_s19 }
  0x1d   : > { %v259_v0 = vld [vmem:[%s3720_s30] sm:$0xff]  ;;  %v261_v1 = vld [vmem:[%s3720_s30 + $0x8] sm:$0xff]  ;;  %v263_v2 = vld [vmem:[%s3720_s30 + $0x10] sm:$0xff] }
  0x1e   : > { %260 = vst [vmem:[#allocation2 + $0x30] sm:$0xff] %v259_v0  ;;  %262 = vst [vmem:[#allocation2] sm:$0xff] %v261_v1  ;;  %v265_v3 = vld [vmem:[%s3720_s30 + $0x18] sm:$0xff]  ;;  %v267_v4 = vld [vmem:[%s3720_s30 + $0x20] sm:$0xff] }
  0x1f   : > { %264 = vst [vmem:[#allocation2 + $0x58] sm:$0xff] %v263_v2  ;;  %v269_v5 = vld [vmem:[%s3720_s30 + $0x28] sm:$0xff]  ;;  %266 = vst [vmem:[#allocation2 + $0x18] sm:$0xff] %v265_v3  ;;  %v271_v6 = vld [vmem:[%s3720_s30 + $0x30] sm:$0xff] }
  0x20   : > { %268 = vst [vmem:[#allocation2 + $0x50] sm:$0xff] %v267_v4  ;;  %270 = vst [vmem:[#allocation2 + $0x68] sm:$0xff] %v269_v5  ;;  %v273_v7 = vld [vmem:[%s3720_s30 + $0x38] sm:$0xff]  ;;  %v275_v8 = vld [vmem:[%s3720_s30 + $0x40] sm:$0xff] }
  0x21   : > { %272 = vst [vmem:[#allocation2 + $0x8] sm:$0xff] %v271_v6  ;;  %274 = vst [vmem:[#allocation2 + $0x48] sm:$0xff] %v273_v7  ;;  %v277_v9 = vld [vmem:[%s3720_s30 + $0x48] sm:$0xff]  ;;  %v279_v10 = vld [vmem:[%s3720_s30 + $0x50] sm:$0xff] }
  0x22   : > { %276 = vst [vmem:[#allocation2 + $0x40] sm:$0xff] %v275_v8  ;;  %v281_v11 = vld [vmem:[%s3720_s30 + $0x58] sm:$0xff]  ;;  %278 = vst [vmem:[#allocation2 + $0x20] sm:$0xff] %v277_v9  ;;  %v283_v12 = vld [vmem:[%s3720_s30 + $0x60] sm:$0xff] }
  0x23   : > { %280 = vst [vmem:[#allocation2 + $0x10] sm:$0xff] %v279_v10  ;;  %282 = vst [vmem:[#allocation2 + $0x38] sm:$0xff] %v281_v11  ;;  %v285_v13 = vld [vmem:[%s3720_s30 + $0x68] sm:$0xff]  ;;  %v287_v14 = vld [vmem:[%s3720_s30 + $0x70] sm:$0xff] }
  0x24   : > { %284 = vst [vmem:[#allocation2 + $0x60] sm:$0xff] %v283_v12  ;;  %286 = vst [vmem:[#allocation2 + $0x70] sm:$0xff] %v285_v13  ;;  %v289_v15 = vld [vmem:[%s3720_s30 + $0x78] sm:$0xff] }
  0x25   : > { %288 = vst [vmem:[#allocation2 + $0x78] sm:$0xff] %v287_v14  ;;  %290 = vst [vmem:[#allocation2 + $0x28] sm:$0xff] %v289_v15 }
  0x26   : > { %298 = vsyncadd [#allocation5], 2048 }
  0x27   : > { %3558 = dma.done.wait [#allocation5], 2048 }
  0x28   : > { %3559 = vsyncadd [#allocation5], 4294965248 }
  0x29 PF: > { %s2766_s9 = smul.u32 192, %s3578_s24  ;;  %v302_v16 = vld [vmem:[#allocation2 + $0x30] sm:$0xff]  ;;  %v303_v17 = vld [vmem:[#allocation2] sm:$0xff]  ;;  %v304_v21 = vld [vmem:[#allocation2 + $0x58] sm:$0xff]  ;;  %p2626_p13 = scmp.lt.s32.totalorder %s3578_s24, 1 }
  0x2a   : > { %v310_v18 = vld [vmem:[#allocation2 + $0x40] sm:$0xff]  ;;  %v318_v19 = vpack.c.bf16 %v303_v17, %v302_v16  ;;  %v305_v22 = vld [vmem:[#allocation2 + $0x18] sm:$0xff]  ;;  %v312_v25 = vld [vmem:[#allocation2 + $0x10] sm:$0xff]  ;;  %s4019_s0 = sld [smem:[#allocation11_spill]] (!%p2626_p13) }
  0x2b   : > { %v311_v20 = vld [vmem:[#allocation2 + $0x20] sm:$0xff]  ;;  %s3742_s14 = scalar_lea.vmem %s4009_s1, %s2766_s9  ;;  %v3744_v24 = vpack.c.bf16 %v305_v22, %v304_v21  ;;  %v313_v26 = vld [vmem:[#allocation2 + $0x38] sm:$0xff]  ;;  %v306_v31 = vld [vmem:[#allocation2 + $0x50] sm:$0xff] }
  0x2c   : > { %v322_v23 = vpack.c.bf16 %v311_v20, %v310_v18  ;;  %v3354_v27 = vld [vmem:[%s3742_s14 + $0x38] sm:$0xff]   ;;  %2803 = vst [vmem:[#allocation3] sm:$0xff] %v318_v19   ;;  %3036 = vmatprep.mubr.bf16.mxu0 %v318_v19  ;;  %v323_v28 = vpack.c.bf16 %v313_v26, %v312_v25  ;;  %v3355_v29 = vld [vmem:[%s3742_s14 + $0x30] sm:$0xff]   ;;  %v3356_v30 = vld [vmem:[%s3742_s14 + $0x28] sm:$0xff]  }
  0x2d   : > { %2919 = vst [vmem:[#allocation3 + $0x8] sm:$0xff] %v3744_v24   ;;  %3020 = vmatprep.subr.bf16.mxu0 %v3354_v27  ;;  %3212 = vmatprep.subr.bf16.mxu1 %v3354_v27  ;;  %v3357_v32 = vld [vmem:[%s3742_s14 + $0x20] sm:$0xff]   ;;  %v307_v33 = vld [vmem:[#allocation2 + $0x68] sm:$0xff]  ;;  %v315_v35 = vld [vmem:[#allocation2 + $0x70] sm:$0xff] }
  0x2e   : > { %2922 = vst [vmem:[#allocation3 + $0x20] sm:$0xff] %v322_v23   ;;  %3044 = vmatprep.mubr.bf16.mxu1 %v322_v23  ;;  %2923 = vst [vmem:[#allocation3 + $0x28] sm:$0xff] %v323_v28   ;;  %3021 = vmatpush3.bf16.msra.mxu0 %v3354_v27  ;;  %v314_v34 = vld [vmem:[#allocation2 + $0x60] sm:$0xff]  ;;  %v320_v36 = vpack.c.bf16 %v307_v33, %v306_v31  ;;  %v308_v38 = vld [vmem:[#allocation2 + $0x8] sm:$0xff] }
  0x2f   : > { %3220 = vmatpush3.bf16.msra.mxu1 %v3354_v27  ;;  %3022 = vmatprep.subr.bf16.mxu0 %v3355_v29  ;;  %v324_v37 = vpack.c.bf16 %v315_v35, %v314_v34  ;;  %v309_v39 = vld [vmem:[#allocation2 + $0x48] sm:$0xff]  ;;  %v316_v40 = vld [vmem:[#allocation2 + $0x78] sm:$0xff]  ;;  %v3359_v45 = vld [vmem:[%s3742_s14 + $0x10] sm:$0xff]  }
  0x30   : > { %3213 = vmatprep.subr.bf16.mxu1 %v3355_v29  ;;  %v321_v41 = vpack.c.bf16 %v309_v39, %v308_v38  ;;  %v317_v42 = vld [vmem:[#allocation2 + $0x28] sm:$0xff]  ;;  %2920 = vst [vmem:[#allocation3 + $0x10] sm:$0xff] %v320_v36   ;;  %v3358_v44 = vld [vmem:[%s3742_s14 + $0x18] sm:$0xff]   ;;  %v3361_v47 = vld [vmem:[%s3742_s14] sm:$0xff]  }
  0x31   : > { %2924 = vst [vmem:[#allocation3 + $0x30] sm:$0xff] %v324_v37   ;;  %v325_v43 = vpack.c.bf16 %v317_v42, %v316_v40  ;;  %v3360_v46 = vld [vmem:[%s3742_s14 + $0x8] sm:$0xff]  }
  0x32   : > { %3023 = vmatpush3.bf16.msra.mxu0 %v3355_v29  ;;  %2921 = vst [vmem:[#allocation3 + $0x18] sm:$0xff] %v321_v41  }
  0x33   : > { %3221 = vmatpush3.bf16.msra.mxu1 %v3355_v29  ;;  %3024 = vmatprep.subr.bf16.mxu0 %v3356_v30  ;;  %2925 = vst [vmem:[#allocation3 + $0x38] sm:$0xff] %v325_v43  }
  0x34   : > { %3214 = vmatprep.subr.bf16.mxu1 %v3356_v30 }
  0x36   : > { %3025 = vmatpush3.bf16.msra.mxu0 %v3356_v30 }
  0x37   : > { %3222 = vmatpush3.bf16.msra.mxu1 %v3356_v30  ;;  %3026 = vmatprep.subr.bf16.mxu0 %v3357_v32 }
  0x38   : > { %3215 = vmatprep.subr.bf16.mxu1 %v3357_v32 }
  0x3a   : > { %3027 = vmatpush3.bf16.msra.mxu0 %v3357_v32 }
  0x3b   : > { %3223 = vmatpush3.bf16.msra.mxu1 %v3357_v32  ;;  %3028 = vmatprep.subr.bf16.mxu0 %v3358_v44 }
  0x3c   : > { %3216 = vmatprep.subr.bf16.mxu1 %v3358_v44 }
  0x3e   : > { %3029 = vmatpush3.bf16.msra.mxu0 %v3358_v44 }
  0x3f   : > { %3224 = vmatpush3.bf16.msra.mxu1 %v3358_v44  ;;  %3030 = vmatprep.subr.bf16.mxu0 %v3359_v45 }
  0x40   : > { %3217 = vmatprep.subr.bf16.mxu1 %v3359_v45 }
  0x42   : > { %3031 = vmatpush3.bf16.msra.mxu0 %v3359_v45 }
  0x43   : > { %3225 = vmatpush3.bf16.msra.mxu1 %v3359_v45  ;;  %3032 = vmatprep.subr.bf16.mxu0 %v3360_v46 }
  0x44   : > { %3218 = vmatprep.subr.bf16.mxu1 %v3360_v46 }
  0x46   : > { %3033 = vmatpush3.bf16.msra.mxu0 %v3360_v46 }
  0x47   : > { %3226 = vmatpush3.bf16.msra.mxu1 %v3360_v46  ;;  %3034 = vmatprep.subr.bf16.mxu0 %v3361_v47 }
  0x48   : > { %3219 = vmatprep.subr.bf16.mxu1 %v3361_v47 }
  0x4a   : > { %3035 = vmatpush3.bf16.msra.mxu0 %v3361_v47 }
  0x4b   : > { %3227 = vmatpush3.bf16.msra.mxu1 %v3361_v47 }
  0x4d   : > { %3037 = vmatmul.mubr.bf16.vlgmr.msra.gmra.mxu0 %v3744_v24 }
  0x4e   : > { %3045 = vmatmul.mubr.bf16.vlgmr.msra.gmra.mxu1 %v323_v28  ;;  %3040 = vmatprep.mubr.bf16.mxu0 %v320_v36 }
  0x4f   : > { %3048 = vmatprep.mubr.bf16.mxu1 %v324_v37 }
  0x55   : > { %3041 = vmatmul.mubr.bf16.gmra.mxu0 %v321_v41 }
  0x56   : > { %3049 = vmatmul.mubr.bf16.gmra.mxu1 %v325_v43 }
 0x10d   : > { %v3038_v48 = vpop.f32.mrf.mxu0 }
 0x10e   : > { %v3046_v49 = vpop.f32.mrf.mxu1  ;;  %564 = vst [vmem:[#allocation4 + $0x10] sm:$0xff] %v3038_v48 }
 0x10f   : > { %572 = vst [vmem:[#allocation4 + $0x18] sm:$0xff] %v3046_v49  ;;  %v499_v50 = vpop.f32.mrf.mxu0 }
 0x110   : > { %v531_v51 = vpop.f32.mrf.mxu1  ;;  %562 = vst [vmem:[#allocation4 + $0x28] sm:$0xff] %v499_v50 }
 0x111   : > { %570 = vst [vmem:[#allocation4 + $0x20] sm:$0xff] %v531_v51  ;;  %v3039_v52 = vpop.f32.mrf.mxu0 }
 0x112   : > { %v3047_v53 = vpop.f32.mrf.mxu1  ;;  %565 = vst [vmem:[#allocation4 + $0x40] sm:$0xff] %v3039_v52 }
 0x113   : > { %573 = vst [vmem:[#allocation4 + $0x58] sm:$0xff] %v3047_v53  ;;  %v502_v54 = vpop.f32.mrf.mxu0 }
 0x114   : > { %v534_v55 = vpop.f32.mrf.mxu1  ;;  %563 = vst [vmem:[#allocation4 + $0x68] sm:$0xff] %v502_v54 }
 0x115   : > { %571 = vst [vmem:[#allocation4 + $0x78] sm:$0xff] %v534_v55  ;;  %v3042_v56 = vpop.f32.mrf.mxu0 }
 0x116   : > { %v3050_v57 = vpop.f32.mrf.mxu1  ;;  %568 = vst [vmem:[#allocation4 + $0x70] sm:$0xff] %v3042_v56 }
 0x117   : > { %576 = vst [vmem:[#allocation4 + $0x60] sm:$0xff] %v3050_v57  ;;  %v515_v58 = vpop.f32.mrf.mxu0 }
 0x118   : > { %v547_v59 = vpop.f32.mrf.mxu1  ;;  %566 = vst [vmem:[#allocation4 + $0x48] sm:$0xff] %v515_v58 }
 0x119   : > { %574 = vst [vmem:[#allocation4] sm:$0xff] %v547_v59  ;;  %v3043_v60 = vpop.f32.mrf.mxu0  ;;  %581 = sbr.rel (%p2626_p13) target bundleno = 725 (0x2d5), region = 82 }
 0x11a   : > { %v3051_v61 = vpop.f32.mrf.mxu1  ;;  %569 = vst [vmem:[#allocation4 + $0x38] sm:$0xff] %v3043_v60 }
 0x11b   : > { %577 = vst [vmem:[#allocation4 + $0x50] sm:$0xff] %v3051_v61  ;;  %v518_v62 = vpop.f32.mrf.mxu0 }
 0x11c   : > { %v550_v63 = vpop.f32.mrf.mxu1  ;;  %567 = vst [vmem:[#allocation4 + $0x30] sm:$0xff] %v518_v62 }
 0x11d   : > { %575 = vst [vmem:[#allocation4 + $0x8] sm:$0xff] %v550_v63 }
 0x11e   : > { %v3362_v0 = vld [vmem:[#allocation3] sm:$0xff]   ;;  %v3596_v1 = vmov 0.0   ;;  %v3363_v2 = vld [vmem:[#allocation3 + $0x8] sm:$0xff]   ;;  %vm3597_vm0 = vmmov 0   ;;  %vm597_vm1 = vcmask 130048   ;;  %v3365_v4 = vld [vmem:[#allocation3 + $0x10] sm:$0xff]  }
 0x11f   : > { %3052 = vmatprep.subr.bf16.mxu0 %v3596_v1  ;;  %3058 = vmatprep.subr.bf16.mxu1 %v3596_v1  ;;  %v3364_v3 = vld [vmem:[%s4019_s0] sm:$0xff]   ;;  %v3366_v5 = vld [vmem:[#allocation3 + $0x18] sm:$0xff]   ;;  %v3368_v7 = vld [vmem:[#allocation3 + $0x28] sm:$0xff]  }
 0x120   : > { %3053 = vmatpush3.bf16.msra.mxu0 %v3362_v0  ;;  %3054 = vmatprep.mubr.msk.bf16.mxu0 %vm3597_vm0, %v3596_v1  ;;  %v3367_v6 = vld [vmem:[#allocation3 + $0x20] sm:$0xff]   ;;  %v3369_v8 = vld [vmem:[#allocation3 + $0x30] sm:$0xff]   ;;  %v3370_v9 = vld [vmem:[#allocation3 + $0x38] sm:$0xff]  }
 0x121   : > { %3059 = vmatpush3.bf16.msra.mxu1 %v3363_v2  ;;  %3060 = vmatprep.mubr.msk.bf16.mxu1 %vm3597_vm0, %v3596_v1  ;;  %v3371_v10 = vld [vmem:[%s3742_s14 + $0x78] sm:$0xff]   ;;  %v3372_v11 = vld [vmem:[%s3742_s14 + $0x70] sm:$0xff]   ;;  %v3373_v12 = vld [vmem:[%s3742_s14 + $0x68] sm:$0xff]  }
 0x122   : > { %3064 = vmatprep.subr.bf16.mxu0 %v3596_v1  ;;  %3070 = vmatprep.subr.bf16.mxu1 %v3596_v1  ;;  %v3374_v13 = vld [vmem:[%s3742_s14 + $0x60] sm:$0xff]   ;;  %v3375_v14 = vld [vmem:[%s3742_s14 + $0x58] sm:$0xff]   ;;  %v3376_v15 = vld [vmem:[%s3742_s14 + $0x50] sm:$0xff]  }
 0x123   : > { %3055 = vmatmul.mubr.msk.bf16.vlgmr.msra.gmra.mxu0 %vm597_vm1, %v3364_v3  ;;  %v3377_v16 = vld [vmem:[%s3742_s14 + $0x48] sm:$0xff]   ;;  %v3378_v17 = vld [vmem:[%s3742_s14 + $0x40] sm:$0xff]   ;;  %v1067_v2 = vld [vmem:[#allocation4 + $0x10] sm:$0xff] }
 0x124   : > { %3061 = vmatmul.mubr.msk.bf16.vlgmr.msra.gmra.mxu1 %vm597_vm1, %v3364_v3  ;;  %3065 = vmatpush3.bf16.msra.mxu0 %v3365_v4  ;;  %v1065_v4 = vld [vmem:[#allocation4 + $0x28] sm:$0xff] }
 0x125   : > { %3071 = vmatpush3.bf16.msra.mxu1 %v3366_v5  ;;  %3066 = vmatprep.mubr.msk.bf16.mxu0 %vm3597_vm0, %v3596_v1 }
 0x126   : > { %3072 = vmatprep.mubr.msk.bf16.mxu1 %vm3597_vm0, %v3596_v1  ;;  %3076 = vmatprep.subr.bf16.mxu0 %v3596_v1 }
 0x127   : > { %3082 = vmatprep.subr.bf16.mxu1 %v3596_v1 }
 0x12b   : > { %3067 = vmatmul.mubr.msk.bf16.vlgmr.msra.gmra.mxu0 %vm597_vm1, %v3364_v3 }
 0x12c   : > { %3073 = vmatmul.mubr.msk.bf16.vlgmr.msra.gmra.mxu1 %vm597_vm1, %v3364_v3  ;;  %3077 = vmatpush3.bf16.msra.mxu0 %v3367_v6 }
 0x12d   : > { %3083 = vmatpush3.bf16.msra.mxu1 %v3368_v7  ;;  %3078 = vmatprep.mubr.msk.bf16.mxu0 %vm3597_vm0, %v3596_v1  ;;  %v1068_v7 = vld [vmem:[#allocation4 + $0x40] sm:$0xff] }
 0x12e   : > { %3084 = vmatprep.mubr.msk.bf16.mxu1 %vm3597_vm0, %v3596_v1  ;;  %3088 = vmatprep.subr.bf16.mxu0 %v3596_v1 }
 0x12f   : > { %3094 = vmatprep.subr.bf16.mxu1 %v3596_v1 }
 0x133   : > { %3079 = vmatmul.mubr.msk.bf16.vlgmr.msra.gmra.mxu0 %vm597_vm1, %v3364_v3 }
 0x134   : > { %3085 = vmatmul.mubr.msk.bf16.vlgmr.msra.gmra.mxu1 %vm597_vm1, %v3364_v3  ;;  %3089 = vmatpush3.bf16.msra.mxu0 %v3369_v8 }
 0x135   : > { %3095 = vmatpush3.bf16.msra.mxu1 %v3370_v9  ;;  %3090 = vmatprep.mubr.msk.bf16.mxu0 %vm3597_vm0, %v3596_v1 }
 0x136   : > { %3096 = vmatprep.mubr.msk.bf16.mxu1 %vm3597_vm0, %v3596_v1  ;;  %3100 = vmatprep.subr.bf16.mxu0 %v3371_v10 }
 0x137   : > { %3228 = vmatprep.subr.bf16.mxu1 %v3371_v10 }
 0x13b   : > { %3091 = vmatmul.mubr.msk.bf16.vlgmr.msra.gmra.mxu0 %vm597_vm1, %v3364_v3 }
 0x13c   : > { %3097 = vmatmul.mubr.msk.bf16.vlgmr.msra.gmra.mxu1 %vm597_vm1, %v3364_v3  ;;  %3101 = vmatpush3.bf16.msra.mxu0 %v3371_v10 }
 0x13d   : > { %3102 = vmatprep.subr.bf16.mxu0 %v3372_v11  ;;  %3236 = vmatpush3.bf16.msra.mxu1 %v3371_v10  ;;  %v1066_v10 = vld [vmem:[#allocation4 + $0x68] sm:$0xff] }
 0x13e   : > { %3229 = vmatprep.subr.bf16.mxu1 %v3372_v11 }
 0x140   : > { %3103 = vmatpush3.bf16.msra.mxu0 %v3372_v11 }
 0x141   : > { %3104 = vmatprep.subr.bf16.mxu0 %v3373_v12  ;;  %3237 = vmatpush3.bf16.msra.mxu1 %v3372_v11 }
 0x142   : > { %3230 = vmatprep.subr.bf16.mxu1 %v3373_v12 }
 0x144   : > { %3105 = vmatpush3.bf16.msra.mxu0 %v3373_v12 }
 0x145   : > { %3106 = vmatprep.subr.bf16.mxu0 %v3374_v13  ;;  %3238 = vmatpush3.bf16.msra.mxu1 %v3373_v12 }
 0x146   : > { %3231 = vmatprep.subr.bf16.mxu1 %v3374_v13 }
 0x148   : > { %3107 = vmatpush3.bf16.msra.mxu0 %v3374_v13 }
 0x149   : > { %3239 = vmatpush3.bf16.msra.mxu1 %v3374_v13  ;;  %3108 = vmatprep.subr.bf16.mxu0 %v3375_v14  ;;  %v1071_v13 = vld [vmem:[#allocation4 + $0x70] sm:$0xff] }
 0x14a   : > { %3232 = vmatprep.subr.bf16.mxu1 %v3375_v14 }
 0x14c   : > { %3109 = vmatpush3.bf16.msra.mxu0 %v3375_v14 }
 0x14d   : > { %3240 = vmatpush3.bf16.msra.mxu1 %v3375_v14  ;;  %3110 = vmatprep.subr.bf16.mxu0 %v3376_v15 }
 0x14e   : > { %3233 = vmatprep.subr.bf16.mxu1 %v3376_v15 }
 0x150   : > { %3111 = vmatpush3.bf16.msra.mxu0 %v3376_v15 }
 0x151   : > { %3241 = vmatpush3.bf16.msra.mxu1 %v3376_v15  ;;  %3112 = vmatprep.subr.bf16.mxu0 %v3377_v16 }
 0x152   : > { %3234 = vmatprep.subr.bf16.mxu1 %v3377_v16 }
 0x154   : > { %3113 = vmatpush3.bf16.msra.mxu0 %v3377_v16 }
 0x155   : > { %3242 = vmatpush3.bf16.msra.mxu1 %v3377_v16  ;;  %3114 = vmatprep.subr.bf16.mxu0 %v3378_v17  ;;  %v1069_v16 = vld [vmem:[#allocation4 + $0x48] sm:$0xff] }
 0x156   : > { %3235 = vmatprep.subr.bf16.mxu1 %v3378_v17 }
 0x158   : > { %3115 = vmatpush3.bf16.msra.mxu0 %v3378_v17 }
 0x159   : > { %3243 = vmatpush3.bf16.msra.mxu1 %v3378_v17 }
 0x1e3   : > { %v635_v18 = vpop.f32.mrf.mxu0 }
 0x1e4   : > { %v694_v19 = vpop.f32.mrf.mxu1 }
 0x1e5   : > { %v3056_v20 = vpop.f32.mrf.mxu0 }
 0x1e6   : > { %v3062_v21 = vpop.f32.mrf.mxu1 }
 0x1e7   : > { %v638_v22 = vpop.f32.mrf.mxu0 }
 0x1e8   : > { %v2842_v23 = vpack.c.bf16 %v638_v22, %v635_v18  ;;  %v697_v24 = vpop.f32.mrf.mxu1  ;;  %v1070_v22 = vld [vmem:[#allocation4 + $0x30] sm:$0xff] }
 0x1e9   : > { %v2847_v25 = vpack.c.bf16 %v697_v24, %v694_v19  ;;  %v3057_v26 = vpop.f32.mrf.mxu0  ;;  %v1072_v19 = vld [vmem:[#allocation4 + $0x38] sm:$0xff] }
 0x1ea   : > { %2843 = vst [vmem:[#allocation3] sm:$0xff] %v2842_v23   ;;  %v3063_v27 = vpop.f32.mrf.mxu1 }
 0x1eb   : > { %2926 = vst [vmem:[#allocation3 + $0x8] sm:$0xff] %v2847_v25   ;;  %v753_v28 = vpop.f32.mrf.mxu0  ;;  %v1075_v25 = vld [vmem:[#allocation4 + $0x18] sm:$0xff] }
 0x1ec   : > { %v812_v29 = vpop.f32.mrf.mxu1 }
 0x1ed   : > { %v3068_v30 = vpop.f32.mrf.mxu0 }
 0x1ee   : > { %v3074_v31 = vpop.f32.mrf.mxu1 }
 0x1ef   : > { %v756_v32 = vpop.f32.mrf.mxu0  ;;  %v1076_v31 = vld [vmem:[#allocation4 + $0x58] sm:$0xff] }
 0x1f0   : > { %v2852_v33 = vpack.c.bf16 %v756_v32, %v753_v28  ;;  %v815_v34 = vpop.f32.mrf.mxu1  ;;  %v1073_v28 = vld [vmem:[#allocation4 + $0x20] sm:$0xff] }
 0x1f1   : > { %v2857_v35 = vpack.c.bf16 %v815_v34, %v812_v29  ;;  %v3069_v36 = vpop.f32.mrf.mxu0  ;;  %v3379_v37 = vld [vmem:[#allocation3] sm:$0xff]   ;;  %v1074_v34 = vld [vmem:[#allocation4 + $0x78] sm:$0xff] }
 0x1f2   : > { %2927 = vst [vmem:[#allocation3 + $0x10] sm:$0xff] %v2852_v33   ;;  %v3075_v38 = vpop.f32.mrf.mxu1  ;;  %v3380_v39 = vld [vmem:[#allocation3 + $0x8] sm:$0xff]   ;;  %3116 = vmatprep.mubr.bf16.mxu0 %v3379_v37  ;;  %v1079_v37 = vld [vmem:[#allocation4 + $0x60] sm:$0xff] }
 0x1f3   : > { %2928 = vst [vmem:[#allocation3 + $0x18] sm:$0xff] %v2857_v35   ;;  %v871_v40 = vpop.f32.mrf.mxu0  ;;  %3117 = vmatmul.mubr.bf16.vlgmr.msra.gmra.mxu0 %v3380_v39 }
 0x1f4   : > { %v930_v41 = vpop.f32.mrf.mxu1 }
 0x1f5   : > { %v3080_v42 = vpop.f32.mrf.mxu0 }
 0x1f6   : > { %v3086_v43 = vpop.f32.mrf.mxu1 }
 0x1f7   : > { %v874_v44 = vpop.f32.mrf.mxu0  ;;  %v1080_v43 = vld [vmem:[#allocation4 + $0x50] sm:$0xff] }
 0x1f8   : > { %v2862_v45 = vpack.c.bf16 %v874_v44, %v871_v40  ;;  %v933_v46 = vpop.f32.mrf.mxu1  ;;  %v1077_v40 = vld [vmem:[#allocation4] sm:$0xff] }
 0x1f9   : > { %v2867_v47 = vpack.c.bf16 %v933_v46, %v930_v41  ;;  %v3081_v48 = vpop.f32.mrf.mxu0  ;;  %v3381_v49 = vld [vmem:[#allocation3 + $0x10] sm:$0xff]   ;;  %v1078_v46 = vld [vmem:[#allocation4 + $0x8] sm:$0xff] }
 0x1fa   : > { %2929 = vst [vmem:[#allocation3 + $0x20] sm:$0xff] %v2862_v45   ;;  %v3087_v50 = vpop.f32.mrf.mxu1  ;;  %v3382_v51 = vld [vmem:[#allocation3 + $0x18] sm:$0xff]   ;;  %3120 = vmatprep.mubr.bf16.mxu0 %v3381_v49 }
 0x1fb   : > { %2930 = vst [vmem:[#allocation3 + $0x28] sm:$0xff] %v2867_v47   ;;  %v989_v52 = vpop.f32.mrf.mxu0  ;;  %3121 = vmatmul.mubr.bf16.gmra.mxu0 %v3382_v51 }
 0x1fc   : > { %v1048_v53 = vpop.f32.mrf.mxu1 }
 0x1fd   : > { %v3092_v54 = vpop.f32.mrf.mxu0 }
 0x1fe   : > { %v3098_v55 = vpop.f32.mrf.mxu1 }
 0x1ff   : > { %v992_v56 = vpop.f32.mrf.mxu0 }
 0x200   : > { %v2872_v57 = vpack.c.bf16 %v992_v56, %v989_v52  ;;  %v1051_v58 = vpop.f32.mrf.mxu1 }
 0x201   : > { %v2877_v59 = vpack.c.bf16 %v1051_v58, %v1048_v53  ;;  %v3093_v60 = vpop.f32.mrf.mxu0  ;;  %v3383_v61 = vld [vmem:[#allocation3 + $0x20] sm:$0xff]  }
 0x202   : > { %2931 = vst [vmem:[#allocation3 + $0x30] sm:$0xff] %v2872_v57   ;;  %v3099_v62 = vpop.f32.mrf.mxu1  ;;  %v3384_v63 = vld [vmem:[#allocation3 + $0x28] sm:$0xff]   ;;  %3124 = vmatprep.mubr.bf16.mxu1 %v3383_v61 }
 0x203   : > { %2932 = vst [vmem:[#allocation3 + $0x38] sm:$0xff] %v2877_v59   ;;  %3125 = vmatmul.mubr.bf16.vlgmr.msra.gmra.mxu1 %v3384_v63 }
 0x209   : > { %v3385_v0 = vld [vmem:[#allocation3 + $0x30] sm:$0xff]  }
 0x20a   : > { %v3386_v1 = vld [vmem:[#allocation3 + $0x38] sm:$0xff]   ;;  %3128 = vmatprep.mubr.bf16.mxu1 %v3385_v0 }
 0x20b   : > { %3129 = vmatmul.mubr.bf16.gmra.mxu1 %v3386_v1 }
 0x2b3   : > { %v3118_v3 = vpop.f32.mrf.mxu0 }
 0x2b4   : > { %v1308_v5 = vadd.f32 %v3118_v3, %v1067_v2 }
 0x2b5   : > { %v1243_v6 = vpop.f32.mrf.mxu0 }
 0x2b6   : > { %1324 = vst [vmem:[#allocation4 + $0x10] sm:$0xff] %v1308_v5  ;;  %v1306_v8 = vadd.f32 %v1243_v6, %v1065_v4 }
 0x2b7   : > { %v3119_v9 = vpop.f32.mrf.mxu0 }
 0x2b8   : > { %1322 = vst [vmem:[#allocation4 + $0x28] sm:$0xff] %v1306_v8  ;;  %v1309_v11 = vadd.f32 %v3119_v9, %v1068_v7 }
 0x2b9   : > { %v1246_v12 = vpop.f32.mrf.mxu0 }
 0x2ba   : > { %1325 = vst [vmem:[#allocation4 + $0x40] sm:$0xff] %v1309_v11  ;;  %v1307_v14 = vadd.f32 %v1246_v12, %v1066_v10 }
 0x2bb   : > { %v3122_v15 = vpop.f32.mrf.mxu0 }
 0x2bc   : > { %1323 = vst [vmem:[#allocation4 + $0x68] sm:$0xff] %v1307_v14  ;;  %v1312_v17 = vadd.f32 %v3122_v15, %v1071_v13 }
 0x2bd   : > { %v1259_v18 = vpop.f32.mrf.mxu0 }
 0x2be   : > { %1328 = vst [vmem:[#allocation4 + $0x70] sm:$0xff] %v1312_v17  ;;  %v1310_v20 = vadd.f32 %v1259_v18, %v1069_v16 }
 0x2bf   : > { %v3123_v21 = vpop.f32.mrf.mxu0 }
 0x2c0   : > { %1326 = vst [vmem:[#allocation4 + $0x48] sm:$0xff] %v1310_v20  ;;  %v1313_v23 = vadd.f32 %v3123_v21, %v1072_v19 }
 0x2c1   : > { %v1262_v24 = vpop.f32.mrf.mxu0 }
 0x2c2   : > { %1329 = vst [vmem:[#allocation4 + $0x38] sm:$0xff] %v1313_v23  ;;  %v1311_v26 = vadd.f32 %v1262_v24, %v1070_v22 }
 0x2c3   : > { %v3126_v27 = vpop.f32.mrf.mxu1 }
 0x2c4   : > { %1327 = vst [vmem:[#allocation4 + $0x30] sm:$0xff] %v1311_v26  ;;  %v1316_v29 = vadd.f32 %v3126_v27, %v1075_v25 }
 0x2c5   : > { %v1275_v30 = vpop.f32.mrf.mxu1 }
 0x2c6   : > { %1332 = vst [vmem:[#allocation4 + $0x18] sm:$0xff] %v1316_v29  ;;  %v1314_v32 = vadd.f32 %v1275_v30, %v1073_v28 }
 0x2c7   : > { %v3127_v33 = vpop.f32.mrf.mxu1 }
 0x2c8   : > { %1330 = vst [vmem:[#allocation4 + $0x20] sm:$0xff] %v1314_v32  ;;  %v1317_v35 = vadd.f32 %v3127_v33, %v1076_v31 }
 0x2c9   : > { %v1278_v36 = vpop.f32.mrf.mxu1 }
 0x2ca   : > { %1333 = vst [vmem:[#allocation4 + $0x58] sm:$0xff] %v1317_v35  ;;  %v1315_v38 = vadd.f32 %v1278_v36, %v1074_v34 }
 0x2cb   : > { %v3130_v39 = vpop.f32.mrf.mxu1 }
 0x2cc   : > { %1331 = vst [vmem:[#allocation4 + $0x78] sm:$0xff] %v1315_v38  ;;  %v1320_v41 = vadd.f32 %v3130_v39, %v1079_v37 }
 0x2cd   : > { %v1291_v42 = vpop.f32.mrf.mxu1 }
 0x2ce   : > { %1336 = vst [vmem:[#allocation4 + $0x60] sm:$0xff] %v1320_v41  ;;  %v1318_v44 = vadd.f32 %v1291_v42, %v1077_v40 }
 0x2cf   : > { %v3131_v45 = vpop.f32.mrf.mxu1 }
 0x2d0   : > { %1334 = vst [vmem:[#allocation4] sm:$0xff] %v1318_v44  ;;  %v1321_v47 = vadd.f32 %v3131_v45, %v1080_v43 }
 0x2d1   : > { %v1294_v48 = vpop.f32.mrf.mxu1 }
 0x2d2   : > { %1337 = vst [vmem:[#allocation4 + $0x50] sm:$0xff] %v1321_v47  ;;  %v1319_v49 = vadd.f32 %v1294_v48, %v1078_v46 }
 0x2d4   : > { %1335 = vst [vmem:[#allocation4 + $0x8] sm:$0xff] %v1319_v49 }
 0x2d5 PF: > { %p2676_p0 = scmp.lt.s32.totalorder %s3578_s24, 2 }
 0x2d6   : > { %s4020_s0 = sld [smem:[#allocation11_spill]] (!%p2676_p0) }
 0x2d7   : > { %1341 = sbr.rel (%p2676_p0) target bundleno = 1171 (0x493), region = 86 }
 0x2dc   : > { %v3387_v50 = vld [vmem:[#allocation3] sm:$0xff]   ;;  %v3598_v51 = vmov 0.0   ;;  %v3388_v52 = vld [vmem:[#allocation3 + $0x8] sm:$0xff]   ;;  %vm3599_vm2 = vmmov 0   ;;  %vm1357_vm3 = vcmask 130048   ;;  %v3390_v54 = vld [vmem:[#allocation3 + $0x10] sm:$0xff]  }
 0x2dd   : > { %3132 = vmatprep.subr.bf16.mxu0 %v3598_v51  ;;  %3138 = vmatprep.subr.bf16.mxu1 %v3598_v51  ;;  %v3389_v53 = vld [vmem:[%s4020_s0] sm:$0xff]   ;;  %v3391_v55 = vld [vmem:[#allocation3 + $0x18] sm:$0xff]   ;;  %v3393_v57 = vld [vmem:[#allocation3 + $0x28] sm:$0xff]  }
 0x2de   : > { %3133 = vmatpush3.bf16.msra.mxu0 %v3387_v50  ;;  %3134 = vmatprep.mubr.msk.bf16.mxu0 %vm3599_vm2, %v3598_v51  ;;  %v3392_v56 = vld [vmem:[#allocation3 + $0x20] sm:$0xff]   ;;  %v3394_v58 = vld [vmem:[#allocation3 + $0x30] sm:$0xff]   ;;  %v3395_v59 = vld [vmem:[#allocation3 + $0x38] sm:$0xff]  }
 0x2df   : > { %3139 = vmatpush3.bf16.msra.mxu1 %v3388_v52  ;;  %3140 = vmatprep.mubr.msk.bf16.mxu1 %vm3599_vm2, %v3598_v51  ;;  %v3396_v60 = vld [vmem:[%s3742_s14 + $0xb8] sm:$0xff]   ;;  %v3397_v61 = vld [vmem:[%s3742_s14 + $0xb0] sm:$0xff]   ;;  %v3398_v62 = vld [vmem:[%s3742_s14 + $0xa8] sm:$0xff]  }
 0x2e0   : > { %3144 = vmatprep.subr.bf16.mxu0 %v3598_v51  ;;  %3150 = vmatprep.subr.bf16.mxu1 %v3598_v51  ;;  %v3399_v63 = vld [vmem:[%s3742_s14 + $0xa0] sm:$0xff]   ;;  %v3400_v0 = vld [vmem:[%s3742_s14 + $0x98] sm:$0xff]   ;;  %v3401_v1 = vld [vmem:[%s3742_s14 + $0x90] sm:$0xff]  }
 0x2e1   : > { %3135 = vmatmul.mubr.msk.bf16.vlgmr.msra.gmra.mxu0 %vm1357_vm3, %v3389_v53  ;;  %v3402_v2 = vld [vmem:[%s3742_s14 + $0x88] sm:$0xff]   ;;  %v3403_v3 = vld [vmem:[%s3742_s14 + $0x80] sm:$0xff]   ;;  %v1827_v52 = vld [vmem:[#allocation4 + $0x10] sm:$0xff] }
 0x2e2   : > { %3141 = vmatmul.mubr.msk.bf16.vlgmr.msra.gmra.mxu1 %vm1357_vm3, %v3389_v53  ;;  %3145 = vmatpush3.bf16.msra.mxu0 %v3390_v54  ;;  %v1825_v54 = vld [vmem:[#allocation4 + $0x28] sm:$0xff] }
 0x2e3   : > { %3151 = vmatpush3.bf16.msra.mxu1 %v3391_v55  ;;  %3146 = vmatprep.mubr.msk.bf16.mxu0 %vm3599_vm2, %v3598_v51 }
 0x2e4   : > { %3152 = vmatprep.mubr.msk.bf16.mxu1 %vm3599_vm2, %v3598_v51  ;;  %3156 = vmatprep.subr.bf16.mxu0 %v3598_v51 }
 0x2e5   : > { %3162 = vmatprep.subr.bf16.mxu1 %v3598_v51 }
 0x2e9   : > { %3147 = vmatmul.mubr.msk.bf16.vlgmr.msra.gmra.mxu0 %vm1357_vm3, %v3389_v53 }
 0x2ea   : > { %3153 = vmatmul.mubr.msk.bf16.vlgmr.msra.gmra.mxu1 %vm1357_vm3, %v3389_v53  ;;  %3157 = vmatpush3.bf16.msra.mxu0 %v3392_v56 }
 0x2eb   : > { %3163 = vmatpush3.bf16.msra.mxu1 %v3393_v57  ;;  %3158 = vmatprep.mubr.msk.bf16.mxu0 %vm3599_vm2, %v3598_v51  ;;  %v1828_v57 = vld [vmem:[#allocation4 + $0x40] sm:$0xff] }
 0x2ec   : > { %3164 = vmatprep.mubr.msk.bf16.mxu1 %vm3599_vm2, %v3598_v51  ;;  %3168 = vmatprep.subr.bf16.mxu0 %v3598_v51 }
 0x2ed   : > { %3174 = vmatprep.subr.bf16.mxu1 %v3598_v51 }
 0x2f1   : > { %3159 = vmatmul.mubr.msk.bf16.vlgmr.msra.gmra.mxu0 %vm1357_vm3, %v3389_v53 }
 0x2f2   : > { %3165 = vmatmul.mubr.msk.bf16.vlgmr.msra.gmra.mxu1 %vm1357_vm3, %v3389_v53  ;;  %3169 = vmatpush3.bf16.msra.mxu0 %v3394_v58 }
 0x2f3   : > { %3175 = vmatpush3.bf16.msra.mxu1 %v3395_v59  ;;  %3170 = vmatprep.mubr.msk.bf16.mxu0 %vm3599_vm2, %v3598_v51 }
 0x2f4   : > { %3176 = vmatprep.mubr.msk.bf16.mxu1 %vm3599_vm2, %v3598_v51  ;;  %3180 = vmatprep.subr.bf16.mxu0 %v3396_v60 }
 0x2f5   : > { %3244 = vmatprep.subr.bf16.mxu1 %v3396_v60 }
 0x2f9   : > { %3171 = vmatmul.mubr.msk.bf16.vlgmr.msra.gmra.mxu0 %vm1357_vm3, %v3389_v53 }
 0x2fa   : > { %3177 = vmatmul.mubr.msk.bf16.vlgmr.msra.gmra.mxu1 %vm1357_vm3, %v3389_v53  ;;  %3181 = vmatpush3.bf16.msra.mxu0 %v3396_v60 }
 0x2fb   : > { %3182 = vmatprep.subr.bf16.mxu0 %v3397_v61  ;;  %3252 = vmatpush3.bf16.msra.mxu1 %v3396_v60  ;;  %v1826_v60 = vld [vmem:[#allocation4 + $0x68] sm:$0xff] }
 0x2fc   : > { %3245 = vmatprep.subr.bf16.mxu1 %v3397_v61 }
 0x2fe   : > { %3183 = vmatpush3.bf16.msra.mxu0 %v3397_v61 }
 0x2ff   : > { %3184 = vmatprep.subr.bf16.mxu0 %v3398_v62  ;;  %3253 = vmatpush3.bf16.msra.mxu1 %v3397_v61 }
 0x300   : > { %3246 = vmatprep.subr.bf16.mxu1 %v3398_v62 }
 0x302   : > { %3185 = vmatpush3.bf16.msra.mxu0 %v3398_v62 }
 0x303   : > { %3186 = vmatprep.subr.bf16.mxu0 %v3399_v63  ;;  %3254 = vmatpush3.bf16.msra.mxu1 %v3398_v62 }
 0x304   : > { %3247 = vmatprep.subr.bf16.mxu1 %v3399_v63 }
 0x306   : > { %3187 = vmatpush3.bf16.msra.mxu0 %v3399_v63 }
 0x307   : > { %3255 = vmatpush3.bf16.msra.mxu1 %v3399_v63  ;;  %3188 = vmatprep.subr.bf16.mxu0 %v3400_v0  ;;  %v1831_v63 = vld [vmem:[#allocation4 + $0x70] sm:$0xff] }
 0x308   : > { %3248 = vmatprep.subr.bf16.mxu1 %v3400_v0 }
 0x30a   : > { %3189 = vmatpush3.bf16.msra.mxu0 %v3400_v0 }
 0x30b   : > { %3256 = vmatpush3.bf16.msra.mxu1 %v3400_v0  ;;  %3190 = vmatprep.subr.bf16.mxu0 %v3401_v1 }
 0x30c   : > { %3249 = vmatprep.subr.bf16.mxu1 %v3401_v1 }
 0x30e   : > { %3191 = vmatpush3.bf16.msra.mxu0 %v3401_v1 }
 0x30f   : > { %3257 = vmatpush3.bf16.msra.mxu1 %v3401_v1  ;;  %3192 = vmatprep.subr.bf16.mxu0 %v3402_v2 }
 0x310   : > { %3250 = vmatprep.subr.bf16.mxu1 %v3402_v2 }
 0x312   : > { %3193 = vmatpush3.bf16.msra.mxu0 %v3402_v2 }
 0x313   : > { %3258 = vmatpush3.bf16.msra.mxu1 %v3402_v2  ;;  %3194 = vmatprep.subr.bf16.mxu0 %v3403_v3  ;;  %v1829_v2 = vld [vmem:[#allocation4 + $0x48] sm:$0xff] }
 0x314   : > { %3251 = vmatprep.subr.bf16.mxu1 %v3403_v3 }
 0x316   : > { %3195 = vmatpush3.bf16.msra.mxu0 %v3403_v3 }
 0x317   : > { %3259 = vmatpush3.bf16.msra.mxu1 %v3403_v3 }
 0x3a1   : > { %v1395_v4 = vpop.f32.mrf.mxu0 }
 0x3a2   : > { %v1454_v5 = vpop.f32.mrf.mxu1 }
 0x3a3   : > { %v3136_v6 = vpop.f32.mrf.mxu0 }
 0x3a4   : > { %v3142_v7 = vpop.f32.mrf.mxu1 }
 0x3a5   : > { %v1398_v8 = vpop.f32.mrf.mxu0 }
 0x3a6   : > { %v2882_v9 = vpack.c.bf16 %v1398_v8, %v1395_v4  ;;  %v1457_v10 = vpop.f32.mrf.mxu1  ;;  %v1830_v8 = vld [vmem:[#allocation4 + $0x30] sm:$0xff] }
 0x3a7   : > { %v2887_v11 = vpack.c.bf16 %v1457_v10, %v1454_v5  ;;  %v3137_v12 = vpop.f32.mrf.mxu0  ;;  %v1832_v5 = vld [vmem:[#allocation4 + $0x38] sm:$0xff] }
 0x3a8   : > { %2883 = vst [vmem:[#allocation3] sm:$0xff] %v2882_v9   ;;  %v3143_v13 = vpop.f32.mrf.mxu1 }
 0x3a9   : > { %2933 = vst [vmem:[#allocation3 + $0x8] sm:$0xff] %v2887_v11   ;;  %v1513_v14 = vpop.f32.mrf.mxu0  ;;  %v1835_v11 = vld [vmem:[#allocation4 + $0x18] sm:$0xff] }
 0x3aa   : > { %v1572_v15 = vpop.f32.mrf.mxu1 }
 0x3ab   : > { %v3148_v16 = vpop.f32.mrf.mxu0 }
 0x3ac   : > { %v3154_v17 = vpop.f32.mrf.mxu1 }
 0x3ad   : > { %v1516_v18 = vpop.f32.mrf.mxu0  ;;  %v1836_v17 = vld [vmem:[#allocation4 + $0x58] sm:$0xff] }
 0x3ae   : > { %v2892_v19 = vpack.c.bf16 %v1516_v18, %v1513_v14  ;;  %v1575_v20 = vpop.f32.mrf.mxu1  ;;  %v1833_v14 = vld [vmem:[#allocation4 + $0x20] sm:$0xff] }
 0x3af   : > { %v2897_v21 = vpack.c.bf16 %v1575_v20, %v1572_v15  ;;  %v3149_v22 = vpop.f32.mrf.mxu0  ;;  %v3404_v23 = vld [vmem:[#allocation3] sm:$0xff]   ;;  %v1834_v20 = vld [vmem:[#allocation4 + $0x78] sm:$0xff] }
 0x3b0   : > { %2934 = vst [vmem:[#allocation3 + $0x10] sm:$0xff] %v2892_v19   ;;  %v3155_v24 = vpop.f32.mrf.mxu1  ;;  %v3405_v25 = vld [vmem:[#allocation3 + $0x8] sm:$0xff]   ;;  %3196 = vmatprep.mubr.bf16.mxu0 %v3404_v23  ;;  %v1839_v23 = vld [vmem:[#allocation4 + $0x60] sm:$0xff] }
 0x3b1   : > { %2935 = vst [vmem:[#allocation3 + $0x18] sm:$0xff] %v2897_v21   ;;  %v1631_v26 = vpop.f32.mrf.mxu0  ;;  %3197 = vmatmul.mubr.bf16.vlgmr.msra.gmra.mxu0 %v3405_v25 }
 0x3b2   : > { %v1690_v27 = vpop.f32.mrf.mxu1 }
 0x3b3   : > { %v3160_v28 = vpop.f32.mrf.mxu0 }
 0x3b4   : > { %v3166_v29 = vpop.f32.mrf.mxu1 }
 0x3b5   : > { %v1634_v30 = vpop.f32.mrf.mxu0  ;;  %v1840_v29 = vld [vmem:[#allocation4 + $0x50] sm:$0xff] }
 0x3b6   : > { %v2902_v31 = vpack.c.bf16 %v1634_v30, %v1631_v26  ;;  %v1693_v32 = vpop.f32.mrf.mxu1  ;;  %v1837_v26 = vld [vmem:[#allocation4] sm:$0xff] }
 0x3b7   : > { %v2907_v33 = vpack.c.bf16 %v1693_v32, %v1690_v27  ;;  %v3161_v34 = vpop.f32.mrf.mxu0  ;;  %v3406_v35 = vld [vmem:[#allocation3 + $0x10] sm:$0xff]   ;;  %v1838_v32 = vld [vmem:[#allocation4 + $0x8] sm:$0xff] }
 0x3b8   : > { %2936 = vst [vmem:[#allocation3 + $0x20] sm:$0xff] %v2902_v31   ;;  %v3167_v36 = vpop.f32.mrf.mxu1  ;;  %v3407_v37 = vld [vmem:[#allocation3 + $0x18] sm:$0xff]   ;;  %3200 = vmatprep.mubr.bf16.mxu0 %v3406_v35 }
 0x3b9   : > { %2937 = vst [vmem:[#allocation3 + $0x28] sm:$0xff] %v2907_v33   ;;  %v1749_v38 = vpop.f32.mrf.mxu0  ;;  %3201 = vmatmul.mubr.bf16.gmra.mxu0 %v3407_v37 }
 0x3ba   : > { %v1808_v39 = vpop.f32.mrf.mxu1 }
 0x3bb   : > { %v3172_v40 = vpop.f32.mrf.mxu0 }
 0x3bc   : > { %v3178_v41 = vpop.f32.mrf.mxu1 }
 0x3bd   : > { %v1752_v42 = vpop.f32.mrf.mxu0 }
 0x3be   : > { %v2912_v43 = vpack.c.bf16 %v1752_v42, %v1749_v38  ;;  %v1811_v44 = vpop.f32.mrf.mxu1 }
 0x3bf   : > { %v2917_v45 = vpack.c.bf16 %v1811_v44, %v1808_v39  ;;  %v3173_v46 = vpop.f32.mrf.mxu0  ;;  %v3408_v47 = vld [vmem:[#allocation3 + $0x20] sm:$0xff]  }
 0x3c0   : > { %2938 = vst [vmem:[#allocation3 + $0x30] sm:$0xff] %v2912_v43   ;;  %v3179_v48 = vpop.f32.mrf.mxu1  ;;  %v3409_v49 = vld [vmem:[#allocation3 + $0x28] sm:$0xff]   ;;  %3204 = vmatprep.mubr.bf16.mxu1 %v3408_v47 }
 0x3c1   : > { %2939 = vst [vmem:[#allocation3 + $0x38] sm:$0xff] %v2917_v45   ;;  %3205 = vmatmul.mubr.bf16.vlgmr.msra.gmra.mxu1 %v3409_v49 }
 0x3c7   : > { %v3410_v50 = vld [vmem:[#allocation3 + $0x30] sm:$0xff]  }
 0x3c8   : > { %v3411_v51 = vld [vmem:[#allocation3 + $0x38] sm:$0xff]   ;;  %3208 = vmatprep.mubr.bf16.mxu1 %v3410_v50 }
 0x3c9   : > { %3209 = vmatmul.mubr.bf16.gmra.mxu1 %v3411_v51 }
 0x471   : > { %v3198_v53 = vpop.f32.mrf.mxu0 }
 0x472   : > { %v2068_v55 = vadd.f32 %v3198_v53, %v1827_v52 }
 0x473   : > { %v2003_v56 = vpop.f32.mrf.mxu0 }
 0x474   : > { %2084 = vst [vmem:[#allocation4 + $0x10] sm:$0xff] %v2068_v55  ;;  %v2066_v58 = vadd.f32 %v2003_v56, %v1825_v54 }
 0x475   : > { %v3199_v59 = vpop.f32.mrf.mxu0 }
 0x476   : > { %2082 = vst [vmem:[#allocation4 + $0x28] sm:$0xff] %v2066_v58  ;;  %v2069_v61 = vadd.f32 %v3199_v59, %v1828_v57 }
 0x477   : > { %v2006_v62 = vpop.f32.mrf.mxu0 }
 0x478   : > { %2085 = vst [vmem:[#allocation4 + $0x40] sm:$0xff] %v2069_v61  ;;  %v2067_v0 = vadd.f32 %v2006_v62, %v1826_v60 }
 0x479   : > { %v3202_v1 = vpop.f32.mrf.mxu0 }
 0x47a   : > { %2083 = vst [vmem:[#allocation4 + $0x68] sm:$0xff] %v2067_v0  ;;  %v2072_v3 = vadd.f32 %v3202_v1, %v1831_v63 }
 0x47b   : > { %v2019_v4 = vpop.f32.mrf.mxu0 }
 0x47c   : > { %2088 = vst [vmem:[#allocation4 + $0x70] sm:$0xff] %v2072_v3  ;;  %v2070_v6 = vadd.f32 %v2019_v4, %v1829_v2 }
 0x47d   : > { %v3203_v7 = vpop.f32.mrf.mxu0 }
 0x47e   : > { %2086 = vst [vmem:[#allocation4 + $0x48] sm:$0xff] %v2070_v6  ;;  %v2073_v9 = vadd.f32 %v3203_v7, %v1832_v5 }
 0x47f   : > { %v2022_v10 = vpop.f32.mrf.mxu0 }
 0x480   : > { %2089 = vst [vmem:[#allocation4 + $0x38] sm:$0xff] %v2073_v9  ;;  %v2071_v12 = vadd.f32 %v2022_v10, %v1830_v8 }
 0x481   : > { %v3206_v13 = vpop.f32.mrf.mxu1 }
 0x482   : > { %2087 = vst [vmem:[#allocation4 + $0x30] sm:$0xff] %v2071_v12  ;;  %v2076_v15 = vadd.f32 %v3206_v13, %v1835_v11 }
 0x483   : > { %v2035_v16 = vpop.f32.mrf.mxu1 }
 0x484   : > { %2092 = vst [vmem:[#allocation4 + $0x18] sm:$0xff] %v2076_v15  ;;  %v2074_v18 = vadd.f32 %v2035_v16, %v1833_v14 }
 0x485   : > { %v3207_v19 = vpop.f32.mrf.mxu1 }
 0x486   : > { %2090 = vst [vmem:[#allocation4 + $0x20] sm:$0xff] %v2074_v18  ;;  %v2077_v21 = vadd.f32 %v3207_v19, %v1836_v17 }
 0x487   : > { %v2038_v22 = vpop.f32.mrf.mxu1 }
 0x488   : > { %2093 = vst [vmem:[#allocation4 + $0x58] sm:$0xff] %v2077_v21  ;;  %v2075_v24 = vadd.f32 %v2038_v22, %v1834_v20 }
 0x489   : > { %v3210_v25 = vpop.f32.mrf.mxu1 }
 0x48a   : > { %2091 = vst [vmem:[#allocation4 + $0x78] sm:$0xff] %v2075_v24  ;;  %v2080_v27 = vadd.f32 %v3210_v25, %v1839_v23 }
 0x48b   : > { %v2051_v28 = vpop.f32.mrf.mxu1 }
 0x48c   : > { %2096 = vst [vmem:[#allocation4 + $0x60] sm:$0xff] %v2080_v27  ;;  %v2078_v30 = vadd.f32 %v2051_v28, %v1837_v26 }
 0x48d   : > { %v3211_v31 = vpop.f32.mrf.mxu1 }
 0x48e   : > { %2094 = vst [vmem:[#allocation4] sm:$0xff] %v2078_v30  ;;  %v2081_v33 = vadd.f32 %v3211_v31, %v1840_v29 }
 0x48f   : > { %v2054_v34 = vpop.f32.mrf.mxu1 }
 0x490   : > { %2097 = vst [vmem:[#allocation4 + $0x50] sm:$0xff] %v2081_v33  ;;  %v2079_v35 = vadd.f32 %v2054_v34, %v1838_v32 }
 0x492   : > { %2095 = vst [vmem:[#allocation4 + $0x8] sm:$0xff] %v2079_v35 }
 0x493 PF: > { %v3412_v36 = vld [vmem:[%s4011_s3 + $0x74] ss:$8 sps:$4 sm:$0xff]   ;;  %v3414_v37 = vld [vmem:[%s4011_s3 + $0x70] ss:$8 sps:$4 sm:$0xff]   ;;  %v3600_v38 = vmov 0   ;;  %s2114_s19 = scalar_lea.vmem %s4010_s2, %s3578_s24  ;;  %v2098_v49 = vld [vmem:[#allocation4 + $0x28] sm:$0xff] }
 0x494   : > { %2302 = vmatprep.mubr.bf16.mxu0 %v3600_v38  ;;  %2342 = vmatprep.mubr.bf16.mxu1 %v3600_v38  ;;  %v3415_v39 = vld [vmem:[%s4011_s3 + $0x64] ss:$8 sps:$4 sm:$0xff]   ;;  %v3417_v40 = vld [vmem:[%s4011_s3 + $0x60] ss:$8 sps:$4 sm:$0xff]   ;;  %v3418_v41 = vld [vmem:[%s4011_s3 + $0x54] ss:$8 sps:$4 sm:$0xff]  }
 0x495   : > { %2270 = vmatprep.subr.bf16.mxu0 %v3412_v36  ;;  %3260 = vmatprep.subr.bf16.mxu1 %v3412_v36  ;;  %v3420_v42 = vld [vmem:[%s4011_s3 + $0x50] ss:$8 sps:$4 sm:$0xff]   ;;  %v3421_v43 = vld [vmem:[%s4011_s3 + $0x44] ss:$8 sps:$4 sm:$0xff]   ;;  %v3423_v44 = vld [vmem:[%s4011_s3 + $0x40] ss:$8 sps:$4 sm:$0xff]  }
 0x496   : > { %2271 = vmatpush1.bf16.msra.mxu0 %v3414_v37  ;;  %3268 = vmatpush1.bf16.msra.mxu1 %v3414_v37  ;;  %v3424_v45 = vld [vmem:[%s4011_s3 + $0x34] ss:$8 sps:$4 sm:$0xff]   ;;  %v3426_v46 = vld [vmem:[%s4011_s3 + $0x30] ss:$8 sps:$4 sm:$0xff]   ;;  %v3427_v47 = vld [vmem:[%s4011_s3 + $0x24] ss:$8 sps:$4 sm:$0xff]  }
 0x497   : > { %2272 = vmatprep.subr.bf16.mxu0 %v3415_v39  ;;  %3261 = vmatprep.subr.bf16.mxu1 %v3415_v39  ;;  %v3429_v48 = vld [vmem:[%s4011_s3 + $0x20] ss:$8 sps:$4 sm:$0xff]   ;;  %v2107_v53 = vld [vmem:[#allocation4 + $0x78] sm:$0xff]  ;;  %v3433_v60 = vld [vmem:[%s4011_s3 + $0x4] ss:$8 sps:$4 sm:$0xff]   ;;  %s2745_s20 = sshll.u32 %s3578_s24, 5 }
 0x498   : > { %v2099_v50 = vld [vmem:[#allocation4 + $0x68] sm:$0xff]  ;;  %v3854_v51 = vld [vmem:[%s2114_s19] ss:$0 sm:$0xff]  ;;  %v3430_v54 = vld [vmem:[%s4011_s3 + $0x14] ss:$8 sps:$4 sm:$0xff]   ;;  %s2744_s19 = sshll.u32 %s3582_s25, 4 }
 0x499   : > { %v2106_v52 = vld [vmem:[#allocation4 + $0x20] sm:$0xff]  ;;  %v2122_v55 = vadd.f32 %v3854_v51, %v2098_v49  ;;  %v2123_v56 = vadd.f32 %v3854_v51, %v2099_v50  ;;  %v2131_v58 = vadd.f32 %v3854_v51, %v2107_v53  ;;  %v3432_v59 = vld [vmem:[%s4011_s3 + $0x10] ss:$8 sps:$4 sm:$0xff]   ;;  %v2102_v16 = vld [vmem:[#allocation4 + $0x48] sm:$0xff]  ;;  %s2508_s29 = sadd.s32 %s2745_s20, %s2744_s19  ;;  %s2511_s16 = sshll.u32 %s3713_s18, 4  ;;  %s3951_s16 = int_to_ptr.vmem [resolvable:$true] %s2511_s16 }
 0x49a   : > { %2273 = vmatpush1.bf16.msra.mxu0 %v3417_v40  ;;  %3269 = vmatpush1.bf16.msra.mxu1 %v3417_v40  ;;  %v2130_v57 = vadd.f32 %v3854_v51, %v2106_v52  ;;  %v2100_v1 = vld [vmem:[#allocation4 + $0x10] sm:$0xff]  ;;  %v2101_v2 = vld [vmem:[#allocation4 + $0x40] sm:$0xff]  ;;  %v2108_v4 = vld [vmem:[#allocation4 + $0x18] sm:$0xff]  ;;  %v2126_v20 = vadd.f32 %v3854_v51, %v2102_v16  ;;  %s2746_s0 = sshll.u32 %s2508_s29, 7  ;;  %s4021_s24 = sand.u32 1, %s3570_s22  }
 0x49b   : > { %2274 = vmatprep.subr.bf16.mxu0 %v3418_v41  ;;  %3262 = vmatprep.subr.bf16.mxu1 %v3418_v41  ;;  %v2138_v61 = vmax.f32 %v2122_v55, 0.0  ;;  %v2139_v62 = vmax.f32 %v2123_v56, 0.0  ;;  %v2147_v0 = vmax.f32 %v2131_v58, 0.0  ;;  %v3435_v3 = vld [vmem:[%s4011_s3] ss:$8 sps:$4 sm:$0xff]   ;;  %v2109_v5 = vld [vmem:[#allocation4 + $0x58] sm:$0xff]  ;;  %v2124_v6 = vadd.f32 %v3854_v51, %v2100_v1  ;;  %s3949_s25 = scalar_lea.hbm %s4014_s6, %s2746_s0 }
 0x49c   : > { %v2146_v63 = vmax.f32 %v2130_v57, 0.0  ;;  %v2125_v7 = vadd.f32 %v3854_v51, %v2101_v2  ;;  %v2132_v10 = vadd.f32 %v3854_v51, %v2108_v4  ;;  %v2133_v11 = vadd.f32 %v3854_v51, %v2109_v5  ;;  %v2103_v17 = vld [vmem:[#allocation4 + $0x30] sm:$0xff]  ;;  %v2110_v18 = vld [vmem:[#allocation4] sm:$0xff]  ;;  %v2111_v19 = vld [vmem:[#allocation4 + $0x8] sm:$0xff]  ;;  %s3957_s12 = scalar_lea.sflag [#allocation7], %s4021_s24  ;;  %s3500_s13 = scalar_lea.vmem %s3951_s16, 2048 }
 0x49d   : > { %v2154_v8 = vpack.c.bf16 %v2139_v62, %v2138_v61  ;;  %v2140_v12 = vmax.f32 %v2124_v6, 0.0  ;;  %v2127_v21 = vadd.f32 %v3854_v51, %v2103_v17  ;;  %v2134_v24 = vadd.f32 %v3854_v51, %v2110_v18  ;;  %v2104_v30 = vld [vmem:[#allocation4 + $0x70] sm:$0xff]  ;;  %v2105_v31 = vld [vmem:[#allocation4 + $0x38] sm:$0xff]  ;;  %v2112_v32 = vld [vmem:[#allocation4 + $0x60] sm:$0xff]  ;;  %p3501_p1 = scmp.ne.s32.totalorder %s3951_s16, %s3500_s13  ;;  %s3601_s14 = smov [#allocation6]  }
 0x49e   : > { %2275 = vmatpush1.bf16.msra.mxu0 %v3420_v42  ;;  %3270 = vmatpush1.bf16.msra.mxu1 %v3420_v42  ;;  %v2158_v9 = vpack.c.bf16 %v2147_v0, %v2146_v63  ;;  %v2141_v13 = vmax.f32 %v2125_v7, 0.0  ;;  %v2148_v14 = vmax.f32 %v2132_v10, 0.0  ;;  %v2149_v15 = vmax.f32 %v2133_v11, 0.0  ;;  %v2113_v33 = vld [vmem:[#allocation4 + $0x50] sm:$0xff]  ;;  %v2178_v50 = vld [vmem:[%s4012_s4] sm:$0x3] }
 0x49f   : > { %2276 = vmatprep.subr.bf16.mxu0 %v3421_v43  ;;  %3263 = vmatprep.subr.bf16.mxu1 %v3421_v43  ;;  %v2135_v25 = vadd.f32 %v3854_v51, %v2111_v19  ;;  %v2142_v26 = vmax.f32 %v2126_v20, 0.0  ;;  %v2143_v27 = vmax.f32 %v2127_v21, 0.0  ;;  %v2150_v28 = vmax.f32 %v2134_v24, 0.0  ;;  %p3502_p2 = pnand %p3501_p1, %p3690_p3  ;;  %s3504_s17 = sshll.u32 %s3601_s14, 4  ;;  %s3505_s17 = int_to_ptr.vmem [resolvable:$false] %s3504_s17 }
 0x4a0   : > { %v2155_v22 = vpack.c.bf16 %v2141_v13, %v2140_v12  ;;  %v2159_v23 = vpack.c.bf16 %v2149_v15, %v2148_v14  ;;  %v2128_v34 = vadd.f32 %v3854_v51, %v2104_v30  ;;  %v2129_v35 = vadd.f32 %v3854_v51, %v2105_v31  ;;  %s3506_s19 = scalar_lea.vmem %s3505_s17, 4096  ;;  %p3507_p5 = scmp.lt.s32.totalorder %s3951_s16, %s3505_s17 }
 0x4a1   : > { %v2151_v29 = vmax.f32 %v2135_v25, 0.0  ;;  %v2156_v36 = vpack.c.bf16 %v2143_v27, %v2142_v26  ;;  %v2136_v39 = vadd.f32 %v3854_v51, %v2112_v32  ;;  %v2137_v40 = vadd.f32 %v3854_v51, %v2113_v33  ;;  %p3503_p4 = pneg %p3502_p2  ;;  %p3508_p6 = scmp.lt.s32.totalorder %s3506_s19, %s3500_s13 }
 0x4a2   : > { %2277 = vmatpush1.bf16.msra.mxu0 %v3423_v44  ;;  %3271 = vmatpush1.bf16.msra.mxu1 %v3423_v44  ;;  %v2144_v41 = vmax.f32 %v2128_v34, 0.0  ;;  %v2145_v42 = vmax.f32 %v2129_v35, 0.0 }
 0x4a3   : > { %2278 = vmatprep.subr.bf16.mxu0 %v3424_v45  ;;  %3264 = vmatprep.subr.bf16.mxu1 %v3424_v45  ;;  %v2160_v37 = vpack.c.bf16 %v2151_v29, %v2150_v28  ;;  %v2152_v43 = vmax.f32 %v2136_v39, 0.0  ;;  %v2153_v44 = vmax.f32 %v2137_v40, 0.0  ;;  %p3509_p7 = por %p3508_p6, %p3507_p5 }
 0x4a4   : > { %v2157_v45 = vpack.c.bf16 %v2145_v42, %v2144_v41 }
 0x4a5   : > { %p3510_p9 = pnand %p3509_p7, %p3503_p4 }
 0x4a6   : > { %2279 = vmatpush1.bf16.msra.mxu0 %v3426_v46  ;;  %3272 = vmatpush1.bf16.msra.mxu1 %v3426_v46  ;;  %v2161_v46 = vpack.c.bf16 %v2153_v44, %v2152_v43 }
 0x4a7   : > { %2280 = vmatprep.subr.bf16.mxu0 %v3427_v47  ;;  %3265 = vmatprep.subr.bf16.mxu1 %v3427_v47  ;;  %v2180_v47 = vlaneseq }
 0x4aa   : > { %2281 = vmatpush1.bf16.msra.mxu0 %v3429_v48  ;;  %3273 = vmatpush1.bf16.msra.mxu1 %v3429_v48  ;;  %v2181_v48 = vshrl.u32 %v2180_v47, 7 }
 0x4ab   : > { %2282 = vmatprep.subr.bf16.mxu0 %v3430_v54  ;;  %3266 = vmatprep.subr.bf16.mxu1 %v3430_v54 }
 0x4ac   : > { %v2182_v49 = vsub.s32 0, %v2181_v48  ;;  %v2186_v51 = vsub.s32 1, %v2181_v48 }
 0x4ae   : > { %2283 = vmatpush1.bf16.msra.mxu0 %v3432_v59  ;;  %3274 = vmatpush1.bf16.msra.mxu1 %v3432_v59  ;;  %v3893_v52 = vrot.slane %v2178_v50, %v2182_v49  ;;  %v3895_v53 = vrot.slane %v2178_v50, %v2186_v51 }
 0x4af   : > { %2284 = vmatprep.subr.bf16.mxu0 %v3433_v60  ;;  %3267 = vmatprep.subr.bf16.mxu1 %v3433_v60 }
 0x4b2   : > { %2285 = vmatpush1.bf16.msra.mxu0 %v3435_v3  ;;  %3275 = vmatpush1.bf16.msra.mxu1 %v3435_v3 }
 0x4b5   : > { %2303 = vmatmul.mubr.bf16.vlgmr.msra.gmra.mxu0 %v2154_v8  ;;  %2343 = vmatmul.mubr.bf16.vlgmr.msra.gmra.mxu1 %v2158_v9 }
 0x4b6   : > { %2312 = vmatprep.mubr.bf16.mxu0 %v3600_v38  ;;  %2352 = vmatprep.mubr.bf16.mxu1 %v3600_v38 }
 0x4bd   : > { %2313 = vmatmul.mubr.bf16.gmra.mxu0 %v2155_v22  ;;  %2353 = vmatmul.mubr.bf16.gmra.mxu1 %v2159_v23 }
 0x4be   : > { %2322 = vmatprep.mubr.bf16.mxu0 %v3600_v38  ;;  %2362 = vmatprep.mubr.bf16.mxu1 %v3600_v38 }
 0x4c5   : > { %2323 = vmatmul.mubr.bf16.gmra.mxu0 %v2156_v36  ;;  %2363 = vmatmul.mubr.bf16.gmra.mxu1 %v2160_v37 }
 0x4c6   : > { %2332 = vmatprep.mubr.bf16.mxu0 %v3600_v38  ;;  %2372 = vmatprep.mubr.bf16.mxu1 %v3600_v38 }
 0x4cd   : > { %2333 = vmatmul.mubr.bf16.gmra.mxu0 %v2157_v45  ;;  %2373 = vmatmul.mubr.bf16.gmra.mxu1 %v2161_v46 }
 0x575   : > { %v2304_v54 = vpop.f32.mrf.mxu0  ;;  %v2344_v55 = vpop.f32.mrf.mxu1 }
 0x576   : > { %v2305_v38 = vadd.f32 %v2304_v54, %v3893_v52  ;;  %v2345_v56 = vadd.f32 %v2344_v55, %v3893_v52 }
 0x577   : > { %v2306_v57 = vpop.f32.mrf.mxu0  ;;  %v2346_v58 = vpop.f32.mrf.mxu1 }
 0x578   : > { %2383 = vst [vmem:[#allocation2 + $0x30] sm:$0xff] %v2305_v38  ;;  %2391 = vst [vmem:[#allocation2 + $0x40] sm:$0xff] %v2345_v56  ;;  %v2307_v59 = vadd.f32 %v2306_v57, %v3895_v53  ;;  %v2347_v60 = vadd.f32 %v2346_v58, %v3895_v53 }
 0x579   : > { %v2308_v61 = vpop.f32.mrf.mxu0  ;;  %v2348_v62 = vpop.f32.mrf.mxu1 }
 0x57a   : > { %v2399_v63 = vsub.f32 0.0, %v2307_v59  ;;  %v2407_v0 = vsub.f32 0.0, %v2347_v60  ;;  %v2309_v1 = vadd.f32 %v2308_v61, %v3893_v52  ;;  %v2349_v2 = vadd.f32 %v2348_v62, %v3893_v52 }
 0x57b   : > { %v2310_v3 = vpop.f32.mrf.mxu0  ;;  %v2350_v4 = vpop.f32.mrf.mxu1 }
 0x57c   : > { %v2415_v5 = vmul.f32 1.442695, %v2399_v63  ;;  %v2431_v6 = vmul.f32 1.442695, %v2407_v0  ;;  %2384 = vst [vmem:[#allocation2] sm:$0xff] %v2309_v1  ;;  %2392 = vst [vmem:[#allocation2 + $0x20] sm:$0xff] %v2349_v2  ;;  %v2311_v7 = vadd.f32 %v2310_v3, %v3895_v53  ;;  %v2351_v8 = vadd.f32 %v2350_v4, %v3895_v53 }
 0x57d   : > { %v2314_v9 = vpop.f32.mrf.mxu0  ;;  %v2354_v10 = vpop.f32.mrf.mxu1 }
 0x57e   : > { %3436 = vpow2.f32 %v2415_v5  ;;  %v2400_v11 = vsub.f32 0.0, %v2311_v7  ;;  %v2408_v12 = vsub.f32 0.0, %v2351_v8  ;;  %v2315_v13 = vadd.f32 %v2314_v9, %v3893_v52 }
 0x57f   : > { %3438 = vpow2.f32 %v2431_v6  ;;  %v2355_v14 = vadd.f32 %v2354_v10, %v3893_v52  ;;  %v2316_v15 = vpop.f32.mrf.mxu0  ;;  %v2356_v16 = vpop.f32.mrf.mxu1 }
 0x580   : > { %v2417_v17 = vmul.f32 1.442695, %v2400_v11  ;;  %v2433_v18 = vmul.f32 1.442695, %v2408_v12  ;;  %2385 = vst [vmem:[#allocation2 + $0x58] sm:$0xff] %v2315_v13  ;;  %v2317_v19 = vadd.f32 %v2316_v15, %v3895_v53  ;;  %v2357_v20 = vadd.f32 %v2356_v16, %v3895_v53 }
 0x581   : > { %2393 = vst [vmem:[#allocation2 + $0x10] sm:$0xff] %v2355_v14  ;;  %v2318_v21 = vpop.f32.mrf.mxu0  ;;  %v2358_v22 = vpop.f32.mrf.mxu1 }
 0x582   : > { %3440 = vpow2.f32 %v2417_v17  ;;  %v2401_v23 = vsub.f32 0.0, %v2317_v19  ;;  %v2409_v24 = vsub.f32 0.0, %v2357_v20  ;;  %v2319_v25 = vadd.f32 %v2318_v21, %v3893_v52 }
 0x583   : > { %3442 = vpow2.f32 %v2433_v18  ;;  %v2359_v26 = vadd.f32 %v2358_v22, %v3893_v52  ;;  %v2320_v27 = vpop.f32.mrf.mxu0  ;;  %v2360_v28 = vpop.f32.mrf.mxu1 }
 0x584   : > { %v2419_v29 = vmul.f32 1.442695, %v2401_v23  ;;  %v2435_v30 = vmul.f32 1.442695, %v2409_v24  ;;  %2386 = vst [vmem:[#allocation2 + $0x18] sm:$0xff] %v2319_v25  ;;  %v2321_v31 = vadd.f32 %v2320_v27, %v3895_v53  ;;  %v2361_v32 = vadd.f32 %v2360_v28, %v3895_v53 }
 0x585   : > { %2394 = vst [vmem:[#allocation2 + $0x38] sm:$0xff] %v2359_v26  ;;  %v2324_v33 = vpop.f32.mrf.mxu0  ;;  %v2364_v34 = vpop.f32.mrf.mxu1 }
 0x586   : > { %3444 = vpow2.f32 %v2419_v29  ;;  %v2402_v35 = vsub.f32 0.0, %v2321_v31  ;;  %v2410_v36 = vsub.f32 0.0, %v2361_v32  ;;  %v2325_v37 = vadd.f32 %v2324_v33, %v3893_v52 }
 0x587   : > { %3446 = vpow2.f32 %v2435_v30  ;;  %v2365_v39 = vadd.f32 %v2364_v34, %v3893_v52  ;;  %v2326_v40 = vpop.f32.mrf.mxu0  ;;  %v2366_v41 = vpop.f32.mrf.mxu1 }
 0x588   : > { %v2421_v42 = vmul.f32 1.442695, %v2402_v35  ;;  %v2437_v43 = vmul.f32 1.442695, %v2410_v36  ;;  %2387 = vst [vmem:[#allocation2 + $0x50] sm:$0xff] %v2325_v37  ;;  %v2327_v44 = vadd.f32 %v2326_v40, %v3895_v53  ;;  %v2367_v45 = vadd.f32 %v2366_v41, %v3895_v53 }
 0x589   : > { %2395 = vst [vmem:[#allocation2 + $0x60] sm:$0xff] %v2365_v39  ;;  %v2328_v46 = vpop.f32.mrf.mxu0  ;;  %v2368_v47 = vpop.f32.mrf.mxu1 }
 0x58a   : > { %3448 = vpow2.f32 %v2421_v42  ;;  %v2403_v48 = vsub.f32 0.0, %v2327_v44  ;;  %v2411_v49 = vsub.f32 0.0, %v2367_v45  ;;  %v2329_v50 = vadd.f32 %v2328_v46, %v3893_v52 }
 0x58b   : > { %v3437_v51 = vpop.eup %3436  ;;  %3450 = vpow2.f32 %v2437_v43  ;;  %v2369_v54 = vadd.f32 %v2368_v47, %v3893_v52  ;;  %v2330_v55 = vpop.f32.mrf.mxu0 }
 0x58c   : > { %v2370_v38 = vpop.f32.mrf.mxu1  ;;  %v3439_v56 = vpop.eup %3438  ;;  %v2447_v57 = vadd.f32 1.0, %v3437_v51  ;;  %v2423_v58 = vmul.f32 1.442695, %v2403_v48  ;;  %2388 = vst [vmem:[#allocation2 + $0x68] sm:$0xff] %v2329_v50  ;;  %v2331_v59 = vadd.f32 %v2330_v55, %v3895_v53  ;;  %v2439_v61 = vmul.f32 1.442695, %v2411_v49 }
 0x58d   : > { %v2455_v60 = vadd.f32 1.0, %v3439_v56  ;;  %2396 = vst [vmem:[#allocation2 + $0x70] sm:$0xff] %v2369_v54  ;;  %v2371_v62 = vadd.f32 %v2370_v38, %v3895_v53  ;;  %v2334_v63 = vpop.f32.mrf.mxu0 }
 0x58e   : > { %v2374_v0 = vpop.f32.mrf.mxu1  ;;  %3452 = vrcp.f32 %v2447_v57  ;;  %v2404_v1 = vsub.f32 0.0, %v2331_v59  ;;  %v2335_v2 = vadd.f32 %v2334_v63, %v3893_v52 }
 0x58f   : > { %v2375_v3 = vadd.f32 %v2374_v0, %v3893_v52  ;;  %v3441_v4 = vpop.eup %3440  ;;  %3454 = vrcp.f32 %v2455_v60  ;;  %v2412_v5 = vsub.f32 0.0, %v2371_v62  ;;  %v2336_v6 = vpop.f32.mrf.mxu0 }
 0x590   : > { %v2376_v7 = vpop.f32.mrf.mxu1  ;;  %v3443_v8 = vpop.eup %3442  ;;  %v2448_v9 = vadd.f32 1.0, %v3441_v4  ;;  %3456 = vpow2.f32 %v2423_v58  ;;  %v2425_v10 = vmul.f32 1.442695, %v2404_v1  ;;  %2389 = vst [vmem:[#allocation2 + $0x8] sm:$0xff] %v2335_v2  ;;  %v2337_v11 = vadd.f32 %v2336_v6, %v3895_v53 }
 0x591   : > { %2397 = vst [vmem:[#allocation2 + $0x78] sm:$0xff] %v2375_v3  ;;  %v2456_v12 = vadd.f32 1.0, %v3443_v8  ;;  %3458 = vpow2.f32 %v2439_v61  ;;  %v2441_v13 = vmul.f32 1.442695, %v2412_v5  ;;  %v2377_v14 = vadd.f32 %v2376_v7, %v3895_v53  ;;  %v2338_v15 = vpop.f32.mrf.mxu0 }
 0x592   : > { %v2378_v16 = vpop.f32.mrf.mxu1  ;;  %3460 = vrcp.f32 %v2448_v9  ;;  %v2405_v17 = vsub.f32 0.0, %v2337_v11  ;;  %v2339_v18 = vadd.f32 %v2338_v15, %v3893_v52 }
 0x593   : > { %v2379_v19 = vadd.f32 %v2378_v16, %v3893_v52  ;;  %v3445_v20 = vpop.eup %3444  ;;  %3462 = vrcp.f32 %v2456_v12  ;;  %v2413_v21 = vsub.f32 0.0, %v2377_v14  ;;  %v2340_v22 = vpop.f32.mrf.mxu0 }
 0x594   : > { %v2380_v23 = vpop.f32.mrf.mxu1  ;;  %v3447_v24 = vpop.eup %3446  ;;  %v2449_v25 = vadd.f32 1.0, %v3445_v20  ;;  %3464 = vpow2.f32 %v2425_v10  ;;  %v2427_v26 = vmul.f32 1.442695, %v2405_v17  ;;  %2390 = vst [vmem:[#allocation2 + $0x48] sm:$0xff] %v2339_v18  ;;  %v2341_v27 = vadd.f32 %v2340_v22, %v3895_v53 }
 0x595   : > { %2398 = vst [vmem:[#allocation2 + $0x28] sm:$0xff] %v2379_v19  ;;  %v2457_v28 = vadd.f32 1.0, %v3447_v24  ;;  %3466 = vpow2.f32 %v2441_v13  ;;  %v2443_v29 = vmul.f32 1.442695, %v2413_v21  ;;  %v2381_v30 = vadd.f32 %v2380_v23, %v3895_v53 }
 0x596   : > { %3468 = vrcp.f32 %v2449_v25  ;;  %v2406_v52 = vsub.f32 0.0, %v2341_v27 }
 0x597   : > { %v3449_v31 = vpop.eup %3448  ;;  %3470 = vrcp.f32 %v2457_v28  ;;  %v2414_v32 = vsub.f32 0.0, %v2381_v30 }
 0x598   : > { %v3451_v33 = vpop.eup %3450  ;;  %v2450_v34 = vadd.f32 1.0, %v3449_v31  ;;  %3472 = vpow2.f32 %v2427_v26  ;;  %v2429_v35 = vmul.f32 1.442695, %v2406_v52 }
 0x599   : > { %v2458_v36 = vadd.f32 1.0, %v3451_v33  ;;  %3474 = vpow2.f32 %v2443_v29  ;;  %v2445_v37 = vmul.f32 1.442695, %v2414_v32 }
 0x59a   : > { %3476 = vrcp.f32 %v2450_v34 }
 0x59b   : > { %v3453_v39 = vpop.eup %3452  ;;  %3478 = vrcp.f32 %v2458_v36 }
 0x59c   : > { %v3455_v53 = vpop.eup %3454  ;;  %2479 = vst [vmem:[%s3713_s18] sm:$0xff] %v3453_v39  ;;  %3480 = vpow2.f32 %v2429_v35 }
 0x59d   : > { %v3457_v40 = vpop.eup %3456  ;;  %2487 = vst [vmem:[%s3713_s18 + $0x40] sm:$0xff] %v3455_v53  ;;  %3482 = vpow2.f32 %v2445_v37 }
 0x59e   : > { %v3459_v41 = vpop.eup %3458  ;;  %v2451_v42 = vadd.f32 1.0, %v3457_v40 }
 0x59f   : > { %v3461_v43 = vpop.eup %3460  ;;  %v2459_v44 = vadd.f32 1.0, %v3459_v41 }
 0x5a0   : > { %v3463_v45 = vpop.eup %3462  ;;  %2480 = vst [vmem:[%s3713_s18 + $0x8] sm:$0xff] %v3461_v43  ;;  %3484 = vrcp.f32 %v2451_v42 }
 0x5a1   : > { %v3465_v46 = vpop.eup %3464  ;;  %2488 = vst [vmem:[%s3713_s18 + $0x48] sm:$0xff] %v3463_v45  ;;  %3486 = vrcp.f32 %v2459_v44 }
 0x5a2   : > { %v3467_v47 = vpop.eup %3466  ;;  %v2452_v48 = vadd.f32 1.0, %v3465_v46 }
 0x5a3   : > { %v3469_v49 = vpop.eup %3468  ;;  %v2460_v50 = vadd.f32 1.0, %v3467_v47 }
 0x5a4   : > { %v3471_v51 = vpop.eup %3470  ;;  %2481 = vst [vmem:[%s3713_s18 + $0x10] sm:$0xff] %v3469_v49  ;;  %3488 = vrcp.f32 %v2452_v48 }
 0x5a5   : > { %v3473_v54 = vpop.eup %3472  ;;  %2489 = vst [vmem:[%s3713_s18 + $0x50] sm:$0xff] %v3471_v51  ;;  %3490 = vrcp.f32 %v2460_v50 }
 0x5a6   : > { %v3475_v55 = vpop.eup %3474  ;;  %v2453_v38 = vadd.f32 1.0, %v3473_v54 }
 0x5a7   : > { %v3477_v56 = vpop.eup %3476  ;;  %v2461_v57 = vadd.f32 1.0, %v3475_v55 }
 0x5a8   : > { %v3479_v58 = vpop.eup %3478  ;;  %2482 = vst [vmem:[%s3713_s18 + $0x18] sm:$0xff] %v3477_v56  ;;  %3492 = vrcp.f32 %v2453_v38 }
 0x5a9   : > { %v3481_v59 = vpop.eup %3480  ;;  %2490 = vst [vmem:[%s3713_s18 + $0x58] sm:$0xff] %v3479_v58  ;;  %3494 = vrcp.f32 %v2461_v57 }
 0x5aa   : > { %v3483_v60 = vpop.eup %3482  ;;  %v2454_v61 = vadd.f32 1.0, %v3481_v59 }
 0x5ab   : > { %v2462_v62 = vadd.f32 1.0, %v3483_v60 }
 0x5ac   : > { %3496 = vrcp.f32 %v2454_v61 }
 0x5ad   : > { %v3485_v63 = vpop.eup %3484  ;;  %3498 = vrcp.f32 %v2462_v62 }
 0x5ae   : > { %v3487_v0 = vpop.eup %3486  ;;  %2483 = vst [vmem:[%s3713_s18 + $0x20] sm:$0xff] %v3485_v63 }
 0x5af   : > { %2491 = vst [vmem:[%s3713_s18 + $0x60] sm:$0xff] %v3487_v0 }
 0x5b1   : > { %v3489_v1 = vpop.eup %3488 }
 0x5b2   : > { %v3491_v2 = vpop.eup %3490  ;;  %2484 = vst [vmem:[%s3713_s18 + $0x28] sm:$0xff] %v3489_v1 }
 0x5b3   : > { %2492 = vst [vmem:[%s3713_s18 + $0x68] sm:$0xff] %v3491_v2 }
 0x5b5   : > { %v3493_v3 = vpop.eup %3492 }
 0x5b6   : > { %v3495_v4 = vpop.eup %3494  ;;  %2485 = vst [vmem:[%s3713_s18 + $0x30] sm:$0xff] %v3493_v3 }
 0x5b7   : > { %2493 = vst [vmem:[%s3713_s18 + $0x70] sm:$0xff] %v3495_v4 }
 0x5b9   : > { %v3497_v5 = vpop.eup %3496 }
 0x5ba   : > { %v3499_v6 = vpop.eup %3498  ;;  %2486 = vst [vmem:[%s3713_s18 + $0x38] sm:$0xff] %v3497_v5 }
 0x5bb   : > { %2494 = vst [vmem:[%s3713_s18 + $0x78] sm:$0xff] %v3499_v6 }
 0x5bc   : > { %3513 = shalt.err (!%p3510_p9)
}
 0x5bd   : > { %s3514_s18 = scalar_lea.hbm %s3949_s25, 2048  ;;  %s3518_s0 = scalar_lea.hbm %s4014_s6, 12288 }
 0x5be   : > { %p3515_p10 = scmp.ne.s32.totalorder %s3949_s25, %s3514_s18  ;;  %p3519_p13 = scmp.lt.s32.totalorder %s3949_s25, %s4014_s6 }
 0x5bf   : > { %p3520_p0 = scmp.lt.s32.totalorder %s3518_s0, %s3514_s18 }
 0x5c0   : > { %p3516_p11 = pnand %p3515_p10, %p3690_p3 }
 0x5c1   : > { %p3521_p1 = por %p3520_p0, %p3519_p13 }
 0x5c2   : > { %p3517_p12 = pneg %p3516_p11 }
 0x5c4   : > { %p3522_p2 = pnand %p3521_p1, %p3517_p12 }
 0x5c6   : > { %3525 = shalt.err (!%p3522_p2)
}
 0x5c7   : > { %s3602_s24 = smov 128   ;;  %s3603_s13 = smov 8  }
 0x5c8   : > { %3276 = dma.vmem_to_hbm [thread:$0]  (%p3690_p3), %s3951_s16, 2048, %s3949_s25, %s3957_s12, %s3602_s24, %s3602_s24, %s3603_s13  }
 0x5c9 PF: > { %p3282_p4 = scmp.ge.s32.totalorder %s3594_s28, 2  ;;  %s2526_s14 = sand.u32 1, %s3566_s21  }
 0x5ca   : > { %s2527_s17 = scalar_lea.sflag [#allocation7], %s2526_s14 }
 0x5cb   : > { %p3279_p5 = pnand %p3282_p4, %p3699_p8 }
 0x5cd   : > { %p3280_p6 = pneg %p3279_p5 }
 0x5cf   : > { %3561 = dma.done.wait (%p3280_p6), %s2527_s17, 2048  }
 0x5d0   : > { %3563 = vsyncadd (%p3280_p6), %s2527_s17, 4294965248  ;;  %s19_s28 = sadd.s32 1, %s3594_s28   ;;  %s4022_s21 = smov %s3570_s22 }
 0x5d1   : > { %p16_p7 = scmp.ge.s32.totalorder %s19_s28, 8   ;;  %s4023_s22 = smov %s3574_s23 }
 0x5d2   : > { %s4024_s23 = smov %s3708_s15  ;;  %s4025_s24 = smov %s3586_s26 }
 0x5d3   : > { %s4026_s25 = smov %s3590_s27  ;;  %s4027_s26 = smov %s4030_s7 }
 0x5d4   : > { %s4028_s27 = smov %s4034_s8  ;;  %18 = sbr.rel (!%p16_p7) target bundleno = 7 (0x7), region = 129 }
 0x5d9   :  { %2532 = vsyncpa [#allocation7], 1 }
 0x5da   :  { %2534 = vsyncpa [#allocation7 + $0x1], 1 }
 0x5db   :  { %2535 = vsyncmov [#allocation5] }
 0x5de   :  { %s2536_s10 = vpop.sfrf %2535 }
 0x5df   :  { %p2749_p3 = scmp.ne.s32.totalorder %s2536_s10, 0 }
 0x5e1   :  { %2540 = shalt.err (%p2749_p3)  }

</bundles_post_ra>
